<compile_context>
chip_gen: v7x
topology: tpu7x:2x2x1
jax: 0.10.0
libtpu: 0.0.40
codegen_flags: <defaults>
</compile_context>

<pallas_src>
import numpy as np
import jax
import jax.numpy as jnp
from jax import lax
from jax.experimental import pallas as pl
from jax.experimental.pallas import tpu as pltpu

NEG_SLOPE = 0.05
# tap order matches torch Conv2d weight (kh, kw) row-major with kh = dy+1, kw = dx+1
TAPS = tuple((dy, dx) for dy in (-1, 0, 1) for dx in (-1, 0, 1))


def _leaky(x):
    return jnp.where(x >= 0, x, NEG_SLOPE * x)


def _boundary_masks(H, W):
    """Per-tap validity masks over flattened HW, lane-dense: (9, 1, HW) float32."""
    HW = H * W
    rows = np.arange(HW) // W
    cols = np.arange(HW) % W
    masks = np.zeros((len(TAPS), 1, HW), np.float32)
    for t, (dy, dx) in enumerate(TAPS):
        valid = ((rows + dy >= 0) & (rows + dy < H) &
                 (cols + dx >= 0) & (cols + dx < W))
        masks[t, 0, :] = valid.astype(np.float32)
    return jnp.asarray(masks)


def _make_iem_kernel(H, W, C, first):
    HW = H * W

    def roll_hw(v, s):
        # want shifted[:, i] = v[:, i + s]; pltpu.roll: out[i] = in[i - shift]
        return v if s == 0 else pltpu.roll(v, shift=(-s) % HW, axis=1)

    def kernel(y_ref, u_ref, w3_ref, b3_ref, mask_ref, w5_ref, b5_ref,
               u_out_ref, t_out_ref):
        y = y_ref[0]                                           # (C, HW) f32

        def conv3x3(feat, op):
            # im2col: shifted+masked copies stacked along the contraction (sublane) axis,
            # then a single bf16 MXU matmul against the pre-packed (C, 9C) weight.
            parts = []
            for t, (dy, dx) in enumerate(TAPS):
                s = dy * W + dx
                v = roll_hw(feat, s)
                if s != 0:                                     # center-tap mask is all-ones
                    v = v * mask_ref[t]                        # (1, HW) bcast over C sublanes
                parts.append(v)
            stack = jnp.concatenate(parts, axis=0).astype(jnp.bfloat16)   # (9C, HW)
            out = jnp.dot(w3_ref[op], stack, preferred_element_type=jnp.float32)
            return out + b3_ref[op]                            # (C, HW) + (C, 1)

        def max_op(v):
            # 2x2 forward max (stride 1) with zero padding on bottom/right, as in the module.
            m = v
            for t in (5, 7, 8):                                # taps (0,1), (1,0), (1,1)
                dy, dx = TAPS[t]
                m = jnp.maximum(m, roll_hw(v, dy * W + dx) * mask_ref[t])
            return m

        if first:
            t_hat = max_op(y)
        else:
            u_prev = u_ref[0]
            t_hat = max_op(u_prev) - 0.5 * (u_prev - y)

        # SearchBlock (IMDN-style information distillation)
        d1 = _leaky(conv3x3(t_hat, 0))                         # act(c1_d(x))
        r1 = _leaky(conv3x3(t_hat, 1) + t_hat)                 # act(c1_r(x) + x)
        d2 = _leaky(conv3x3(r1, 2))
        r2 = _leaky(conv3x3(r1, 3) + r1)
        d3 = _leaky(conv3x3(r2, 4))
        r3 = _leaky(conv3x3(r2, 5) + r2)
        r4 = _leaky(conv3x3(r3, 6))                            # act(c4(r_c3))

        # c5: 1x1 conv over concat([d1,d2,d3,r4]) == single (C,4C)x(4C,HW) matmul.
        cat = jnp.concatenate([d1, d2, d3, r4], axis=0).astype(jnp.bfloat16)   # (4C, HW)
        logit = (jnp.dot(w5_ref[...], cat, preferred_element_type=jnp.float32)
                 + b5_ref[...])

        # IEM tail: sigmoid -> clamp -> u = clamp(y / t)
        t = jnp.clip(1.0 / (1.0 + jnp.exp(-logit)), 0.0001, 1.0)
        u_new = jnp.clip(y / t, 0.0, 1.0)
        u_out_ref[0] = u_new.astype(u_out_ref.dtype)
        t_out_ref[0] = t.astype(t_out_ref.dtype)

    return kernel


def _iem_pallas(y, u, w3p, b3k, masks, w5k, b5k, *, H, W, C, first):
    B = y.shape[0]
    HW = H * W
    out_sd = jax.ShapeDtypeStruct((B, C, HW), jnp.float32)
    return pl.pallas_call(
        _make_iem_kernel(H, W, C, first),
        out_shape=(out_sd, out_sd),
        grid=(B,),
        in_specs=[
            pl.BlockSpec((1, C, HW), lambda b: (b, 0, 0)),        # input_y (per batch)
            pl.BlockSpec((1, C, HW), lambda b: (b, 0, 0)),        # previous u (per batch)
            pl.BlockSpec((7, C, 9 * C), lambda b: (0, 0, 0)),     # packed 3x3 weights (bf16)
            pl.BlockSpec((7, C, 1), lambda b: (0, 0, 0)),         # 3x3 biases
            pl.BlockSpec((9, 1, HW), lambda b: (0, 0, 0)),        # lane-dense boundary masks
            pl.BlockSpec((C, 4 * C), lambda b: (0, 0)),           # c5 weight (bf16)
            pl.BlockSpec((C, 1), lambda b: (0, 0)),               # c5 bias
        ],
        out_specs=(pl.BlockSpec((1, C, HW), lambda b: (b, 0, 0)),
                   pl.BlockSpec((1, C, HW), lambda b: (b, 0, 0))),
        compiler_params=pltpu.CompilerParams(dimension_semantics=("parallel",)),
    )(y, u, w3p, b3k, masks, w5k, b5k)


def enhance_network_pallas(x_nchw, w3, b3, w5, b5):
    """x: (B,C,H,W) f32. w3: (iters,7,Cout,Cin,3,3) OIHW. b3: (iters,7,C).
       w5: (iters,C,4C). b5: (iters,C). Returns (u_list, t_list) of (B,C,H,W)."""
    iters = w3.shape[0]
    B, C, H, W = x_nchw.shape
    HW = H * W
    y = x_nchw.reshape(B, C, HW)                # channels-first flatten; no transpose needed
    masks = _boundary_masks(H, W)

    # Pack each op's OIHW 3x3 weight to (C_out, 9*C_in) with flattened index t*C + ci,
    # t = kh*3 + kw, matching the im2col stack row order. MXU operands cast to bf16.
    w3p = jnp.transpose(w3, (0, 1, 2, 4, 5, 3)).reshape(iters, 7, C, 9 * C).astype(jnp.bfloat16)
    b3k = b3.reshape(iters, 7, C, 1).astype(jnp.float32)
    w5k = w5.reshape(iters, C, 4 * C).astype(jnp.bfloat16)
    b5k = b5.reshape(iters, C, 1).astype(jnp.float32)

    u = jnp.ones_like(y)
    u_list, t_list = [], []
    for i in range(iters):
        u, t = _iem_pallas(y, u, w3p[i], b3k[i], masks, w5k[i], b5k[i],
                           H=H, W=W, C=C, first=(i == 0))
        u_list.append(u.reshape(B, C, H, W))
        t_list.append(t.reshape(B, C, H, W))
    return u_list, t_list


# ---------------- pure-JAX reference (for correctness check) ----------------
def _conv3x3_ref(x_nchw, w_oihw, b):
    y = lax.conv_general_dilated(x_nchw, w_oihw, window_strides=(1, 1), padding="SAME",
                                 dimension_numbers=("NCHW", "OIHW", "NCHW"))
    return y + b[None, :, None, None]


def _search_block_ref(x, w3, b3, w5, b5):
    d1 = _leaky(_conv3x3_ref(x, w3[0], b3[0]))
    r1 = _leaky(_conv3x3_ref(x, w3[1], b3[1]) + x)
    d2 = _leaky(_conv3x3_ref(r1, w3[2], b3[2]))
    r2 = _leaky(_conv3x3_ref(r1, w3[3], b3[3]) + r1)
    d3 = _leaky(_conv3x3_ref(r2, w3[4], b3[4]))
    r3 = _leaky(_conv3x3_ref(r2, w3[5], b3[5]) + r2)
    r4 = _leaky(_conv3x3_ref(r3, w3[6], b3[6]))
    cat = jnp.concatenate([d1, d2, d3, r4], axis=1)
    return jnp.einsum("bchw,oc->bohw", cat, w5) + b5[None, :, None, None]


def _max_operation_ref(x):
    xp = jnp.pad(x, ((0, 0), (0, 0), (0, 1), (0, 1)))
    x1 = jnp.maximum(xp[:, :, :-1, :], xp[:, :, 1:, :])
    return jnp.maximum(x1[:, :, :, :-1], x1[:, :, :, 1:])


def enhance_network_ref(x, w3, b3, w5, b5):
    iters = w3.shape[0]
    u = jnp.ones_like(x)
    u_list, t_list = [], []
    for i in range(iters):
        if i == 0:
            t_hat = _max_operation_ref(x)
        else:
            t_hat = _max_operation_ref(u) - 0.5 * (u - x)
        t = _search_block_ref(t_hat, w3[i], b3[i], w5[i], b5[i])
        t = jnp.clip(jax.nn.sigmoid(t), 0.0001, 1.0)
        u = jnp.clip(x / t, 0.0, 1.0)
        u_list.append(u)
        t_list.append(t)
    return u_list, t_list


if __name__ == "__main__":
    ITERS, B, C, H, W = 3, 2, 8, 16, 16
    key = jax.random.PRNGKey(0)
    kx, kw3, kb3, kw5, kb5 = jax.random.split(key, 5)

    x = jax.random.normal(kx, (B, C, H, W), jnp.float32)
    w3 = jax.random.normal(kw3, (ITERS, 7, C, C, 3, 3), jnp.float32) * 0.1   # OIHW per op
    b3 = jax.random.normal(kb3, (ITERS, 7, C), jnp.float32) * 0.1
    w5 = jax.random.normal(kw5, (ITERS, C, 4 * C), jnp.float32) * 0.1        # c5: 4C -> C (1x1)
    b5 = jax.random.normal(kb5, (ITERS, C), jnp.float32) * 0.1

    u_list, t_list = enhance_network_pallas(x, w3, b3, w5, b5)
    jax.block_until_ready(u_list + t_list)

    u_ref, t_ref = enhance_network_ref(x, w3, b3, w5, b5)
    for i in range(ITERS):
        assert u_list[i].shape == (B, C, H, W), u_list[i].shape
        assert t_list[i].shape == (B, C, H, W), t_list[i].shape
        # tolerance accounts for bf16 MXU operands (f32 accumulation) in the kernel path
        err_u = float(jnp.max(jnp.abs(u_list[i] - u_ref[i])))
        err_t = float(jnp.max(jnp.abs(t_list[i] - t_ref[i])))
        assert jnp.allclose(u_list[i], u_ref[i], atol=2e-2, rtol=2e-2), (i, err_u)
        assert jnp.allclose(t_list[i], t_ref[i], atol=2e-2, rtol=2e-2), (i, err_t)
    print("KERNEL_OK")
</pallas_src>

<mosaic_0001>
module attributes {stable_mosaic.version = 11 : i64} {
  func.func @kernel(%arg0: i32, %arg1: memref<1x8x256xf32, #tpu.memory_space<vmem>>, %arg2: memref<1x8x256xf32, #tpu.memory_space<vmem>>, %arg3: memref<7x8x72xbf16, #tpu.memory_space<vmem>>, %arg4: memref<7x8x1xf32, #tpu.memory_space<vmem>>, %arg5: memref<9x1x256xf32, #tpu.memory_space<vmem>>, %arg6: memref<8x32xbf16, #tpu.memory_space<vmem>>, %arg7: memref<8x1xf32, #tpu.memory_space<vmem>>, %arg8: memref<1x8x256xf32, #tpu.memory_space<vmem>>, %arg9: memref<1x8x256xf32, #tpu.memory_space<vmem>>) attributes {dimension_semantics = [#tpu.dimension_semantics<parallel>], iteration_bounds = array<i64: 2>, scalar_prefetch = 0 : i64, scratch_operands = 0 : i64, tpu.core_type = #tpu.core_type<tc>, window_params = [{transform_indices = @transform_0, window_bounds = array<i64: 1, 8, 256>}, {transform_indices = @transform_1, window_bounds = array<i64: 1, 8, 256>}, {pipeline_mode = #tpu.pipeline_mode<synchronous>, transform_indices = @transform_2, window_bounds = array<i64: 7, 8, 72>}, {pipeline_mode = #tpu.pipeline_mode<synchronous>, transform_indices = @transform_3, window_bounds = array<i64: 7, 8, 1>}, {pipeline_mode = #tpu.pipeline_mode<synchronous>, transform_indices = @transform_4, window_bounds = array<i64: 9, 1, 256>}, {pipeline_mode = #tpu.pipeline_mode<synchronous>, transform_indices = @transform_5, window_bounds = array<i64: 8, 32>}, {pipeline_mode = #tpu.pipeline_mode<synchronous>, transform_indices = @transform_6, window_bounds = array<i64: 8, 1>}, {transform_indices = @transform_7, window_bounds = array<i64: 1, 8, 256>}, {transform_indices = @transform_8, window_bounds = array<i64: 1, 8, 256>}]} {
    %c0 = arith.constant 0 : index
    %c0_0 = arith.constant 0 : index
    %c0_1 = arith.constant 0 : index
    %0 = vector.load %arg1[%c0, %c0_0, %c0_1] : memref<1x8x256xf32, #tpu.memory_space<vmem>>, vector<1x8x256xf32>
    %1 = vector.shape_cast %0 : vector<1x8x256xf32> to vector<8x256xf32>
    %c255_i32 = arith.constant 255 : i32
    %2 = tpu.dynamic_rotate %1 by %c255_i32 dim 1 : vector<8x256xf32>, i32 -> vector<8x256xf32>
    %c5 = arith.constant 5 : index
    %c0_2 = arith.constant 0 : index
    %c0_3 = arith.constant 0 : index
    %3 = vector.load %arg5[%c5, %c0_2, %c0_3] : memref<9x1x256xf32, #tpu.memory_space<vmem>>, vector<1x1x256xf32>
    %4 = vector.shape_cast %3 : vector<1x1x256xf32> to vector<1x256xf32>
    %5 = vector.broadcast %4 : vector<1x256xf32> to vector<8x256xf32>
    %6 = arith.mulf %2, %5 : vector<8x256xf32>
    %7 = arith.maximumf %1, %6 : vector<8x256xf32>
    %c240_i32 = arith.constant 240 : i32
    %8 = tpu.dynamic_rotate %1 by %c240_i32 dim 1 : vector<8x256xf32>, i32 -> vector<8x256xf32>
    %c7 = arith.constant 7 : index
    %c0_4 = arith.constant 0 : index
    %c0_5 = arith.constant 0 : index
    %9 = vector.load %arg5[%c7, %c0_4, %c0_5] : memref<9x1x256xf32, #tpu.memory_space<vmem>>, vector<1x1x256xf32>
    %10 = vector.shape_cast %9 : vector<1x1x256xf32> to vector<1x256xf32>
    %11 = vector.broadcast %10 : vector<1x256xf32> to vector<8x256xf32>
    %12 = arith.mulf %8, %11 : vector<8x256xf32>
    %13 = arith.maximumf %7, %12 : vector<8x256xf32>
    %c239_i32 = arith.constant 239 : i32
    %14 = tpu.dynamic_rotate %1 by %c239_i32 dim 1 : vector<8x256xf32>, i32 -> vector<8x256xf32>
    %c8 = arith.constant 8 : index
    %c0_6 = arith.constant 0 : index
    %c0_7 = arith.constant 0 : index
    %15 = vector.load %arg5[%c8, %c0_6, %c0_7] : memref<9x1x256xf32, #tpu.memory_space<vmem>>, vector<1x1x256xf32>
    %16 = vector.shape_cast %15 : vector<1x1x256xf32> to vector<1x256xf32>
    %17 = vector.broadcast %16 : vector<1x256xf32> to vector<8x256xf32>
    %18 = arith.mulf %14, %17 : vector<8x256xf32>
    %19 = arith.maximumf %13, %18 : vector<8x256xf32>
    %c17_i32 = arith.constant 17 : i32
    %20 = tpu.dynamic_rotate %19 by %c17_i32 dim 1 : vector<8x256xf32>, i32 -> vector<8x256xf32>
    %c0_8 = arith.constant 0 : index
    %c0_9 = arith.constant 0 : index
    %c0_10 = arith.constant 0 : index
    %21 = vector.load %arg5[%c0_8, %c0_9, %c0_10] : memref<9x1x256xf32, #tpu.memory_space<vmem>>, vector<1x1x256xf32>
    %22 = vector.shape_cast %21 : vector<1x1x256xf32> to vector<1x256xf32>
    %23 = vector.broadcast %22 : vector<1x256xf32> to vector<8x256xf32>
    %24 = arith.mulf %20, %23 : vector<8x256xf32>
    %c16_i32 = arith.constant 16 : i32
    %25 = tpu.dynamic_rotate %19 by %c16_i32 dim 1 : vector<8x256xf32>, i32 -> vector<8x256xf32>
    %c1 = arith.constant 1 : index
    %c0_11 = arith.constant 0 : index
    %c0_12 = arith.constant 0 : index
    %26 = vector.load %arg5[%c1, %c0_11, %c0_12] : memref<9x1x256xf32, #tpu.memory_space<vmem>>, vector<1x1x256xf32>
    %27 = vector.shape_cast %26 : vector<1x1x256xf32> to vector<1x256xf32>
    %28 = vector.broadcast %27 : vector<1x256xf32> to vector<8x256xf32>
    %29 = arith.mulf %25, %28 : vector<8x256xf32>
    %c15_i32 = arith.constant 15 : i32
    %30 = tpu.dynamic_rotate %19 by %c15_i32 dim 1 : vector<8x256xf32>, i32 -> vector<8x256xf32>
    %c2 = arith.constant 2 : index
    %c0_13 = arith.constant 0 : index
    %c0_14 = arith.constant 0 : index
    %31 = vector.load %arg5[%c2, %c0_13, %c0_14] : memref<9x1x256xf32, #tpu.memory_space<vmem>>, vector<1x1x256xf32>
    %32 = vector.shape_cast %31 : vector<1x1x256xf32> to vector<1x256xf32>
    %33 = vector.broadcast %32 : vector<1x256xf32> to vector<8x256xf32>
    %34 = arith.mulf %30, %33 : vector<8x256xf32>
    %c1_i32 = arith.constant 1 : i32
    %35 = tpu.dynamic_rotate %19 by %c1_i32 dim 1 : vector<8x256xf32>, i32 -> vector<8x256xf32>
    %c3 = arith.constant 3 : index
    %c0_15 = arith.constant 0 : index
    %c0_16 = arith.constant 0 : index
    %36 = vector.load %arg5[%c3, %c0_15, %c0_16] : memref<9x1x256xf32, #tpu.memory_space<vmem>>, vector<1x1x256xf32>
    %37 = vector.shape_cast %36 : vector<1x1x256xf32> to vector<1x256xf32>
    %38 = vector.broadcast %37 : vector<1x256xf32> to vector<8x256xf32>
    %39 = arith.mulf %35, %38 : vector<8x256xf32>
    %c255_i32_17 = arith.constant 255 : i32
    %40 = tpu.dynamic_rotate %19 by %c255_i32_17 dim 1 : vector<8x256xf32>, i32 -> vector<8x256xf32>
    %c5_18 = arith.constant 5 : index
    %c0_19 = arith.constant 0 : index
    %c0_20 = arith.constant 0 : index
    %41 = vector.load %arg5[%c5_18, %c0_19, %c0_20] : memref<9x1x256xf32, #tpu.memory_space<vmem>>, vector<1x1x256xf32>
    %42 = vector.shape_cast %41 : vector<1x1x256xf32> to vector<1x256xf32>
    %43 = vector.broadcast %42 : vector<1x256xf32> to vector<8x256xf32>
    %44 = arith.mulf %40, %43 : vector<8x256xf32>
    %c241_i32 = arith.constant 241 : i32
    %45 = tpu.dynamic_rotate %19 by %c241_i32 dim 1 : vector<8x256xf32>, i32 -> vector<8x256xf32>
    %c6 = arith.constant 6 : index
    %c0_21 = arith.constant 0 : index
    %c0_22 = arith.constant 0 : index
    %46 = vector.load %arg5[%c6, %c0_21, %c0_22] : memref<9x1x256xf32, #tpu.memory_space<vmem>>, vector<1x1x256xf32>
    %47 = vector.shape_cast %46 : vector<1x1x256xf32> to vector<1x256xf32>
    %48 = vector.broadcast %47 : vector<1x256xf32> to vector<8x256xf32>
    %49 = arith.mulf %45, %48 : vector<8x256xf32>
    %c240_i32_23 = arith.constant 240 : i32
    %50 = tpu.dynamic_rotate %19 by %c240_i32_23 dim 1 : vector<8x256xf32>, i32 -> vector<8x256xf32>
    %c7_24 = arith.constant 7 : index
    %c0_25 = arith.constant 0 : index
    %c0_26 = arith.constant 0 : index
    %51 = vector.load %arg5[%c7_24, %c0_25, %c0_26] : memref<9x1x256xf32, #tpu.memory_space<vmem>>, vector<1x1x256xf32>
    %52 = vector.shape_cast %51 : vector<1x1x256xf32> to vector<1x256xf32>
    %53 = vector.broadcast %52 : vector<1x256xf32> to vector<8x256xf32>
    %54 = arith.mulf %50, %53 : vector<8x256xf32>
    %c239_i32_27 = arith.constant 239 : i32
    %55 = tpu.dynamic_rotate %19 by %c239_i32_27 dim 1 : vector<8x256xf32>, i32 -> vector<8x256xf32>
    %c8_28 = arith.constant 8 : index
    %c0_29 = arith.constant 0 : index
    %c0_30 = arith.constant 0 : index
    %56 = vector.load %arg5[%c8_28, %c0_29, %c0_30] : memref<9x1x256xf32, #tpu.memory_space<vmem>>, vector<1x1x256xf32>
    %57 = vector.shape_cast %56 : vector<1x1x256xf32> to vector<1x256xf32>
    %58 = vector.broadcast %57 : vector<1x256xf32> to vector<8x256xf32>
    %59 = arith.mulf %55, %58 : vector<8x256xf32>
    %60 = tpu.concatenate %24, %29, %34, %39, %19, %44, %49, %54, %59 in 0 : vector<8x256xf32>, vector<8x256xf32>, vector<8x256xf32>, vector<8x256xf32>, vector<8x256xf32>, vector<8x256xf32>, vector<8x256xf32>, vector<8x256xf32>, vector<8x256xf32> -> vector<72x256xf32>
    %61 = arith.truncf %60 : vector<72x256xf32> to vector<72x256xbf16>
    %c0_31 = arith.constant 0 : index
    %c0_32 = arith.constant 0 : index
    %c0_33 = arith.constant 0 : index
    %62 = vector.load %arg3[%c0_31, %c0_32, %c0_33] : memref<7x8x72xbf16, #tpu.memory_space<vmem>>, vector<1x8x72xbf16>
    %63 = vector.shape_cast %62 : vector<1x8x72xbf16> to vector<8x72xbf16>
    %cst = arith.constant dense<0.000000e+00> : vector<8x256xf32>
    %64 = tpu.matmul %63, %61, %cst {dimension_numbers = #tpu.dot_dimension_numbers<[1], [0], [0], [1], [0, 0, 1, 1], [], []>} : vector<8x72xbf16>, vector<72x256xbf16>, vector<8x256xf32> -> vector<8x256xf32>
    %c0_34 = arith.constant 0 : index
    %c0_35 = arith.constant 0 : index
    %c0_36 = arith.constant 0 : index
    %65 = vector.load %arg4[%c0_34, %c0_35, %c0_36] : memref<7x8x1xf32, #tpu.memory_space<vmem>>, vector<1x8x1xf32>
    %66 = vector.shape_cast %65 : vector<1x8x1xf32> to vector<8x1xf32>
    %67 = vector.broadcast %66 : vector<8x1xf32> to vector<8x256xf32>
    %68 = arith.addf %64, %67 : vector<8x256xf32>
    %cst_37 = arith.constant 0.000000e+00 : f32
    %69 = vector.broadcast %cst_37 : f32 to vector<8x256xf32>
    %70 = arith.cmpf oge, %68, %69 : vector<8x256xf32>
    %cst_38 = arith.constant 5.000000e-02 : f32
    %71 = vector.broadcast %cst_38 : f32 to vector<8x256xf32>
    %72 = arith.mulf %71, %68 : vector<8x256xf32>
    %73 = arith.select %70, %68, %72 : vector<8x256xi1>, vector<8x256xf32>
    %c17_i32_39 = arith.constant 17 : i32
    %74 = tpu.dynamic_rotate %19 by %c17_i32_39 dim 1 : vector<8x256xf32>, i32 -> vector<8x256xf32>
    %c0_40 = arith.constant 0 : index
    %c0_41 = arith.constant 0 : index
    %c0_42 = arith.constant 0 : index
    %75 = vector.load %arg5[%c0_40, %c0_41, %c0_42] : memref<9x1x256xf32, #tpu.memory_space<vmem>>, vector<1x1x256xf32>
    %76 = vector.shape_cast %75 : vector<1x1x256xf32> to vector<1x256xf32>
    %77 = vector.broadcast %76 : vector<1x256xf32> to vector<8x256xf32>
    %78 = arith.mulf %74, %77 : vector<8x256xf32>
    %c16_i32_43 = arith.constant 16 : i32
    %79 = tpu.dynamic_rotate %19 by %c16_i32_43 dim 1 : vector<8x256xf32>, i32 -> vector<8x256xf32>
    %c1_44 = arith.constant 1 : index
    %c0_45 = arith.constant 0 : index
    %c0_46 = arith.constant 0 : index
    %80 = vector.load %arg5[%c1_44, %c0_45, %c0_46] : memref<9x1x256xf32, #tpu.memory_space<vmem>>, vector<1x1x256xf32>
    %81 = vector.shape_cast %80 : vector<1x1x256xf32> to vector<1x256xf32>
    %82 = vector.broadcast %81 : vector<1x256xf32> to vector<8x256xf32>
    %83 = arith.mulf %79, %82 : vector<8x256xf32>
    %c15_i32_47 = arith.constant 15 : i32
    %84 = tpu.dynamic_rotate %19 by %c15_i32_47 dim 1 : vector<8x256xf32>, i32 -> vector<8x256xf32>
    %c2_48 = arith.constant 2 : index
    %c0_49 = arith.constant 0 : index
    %c0_50 = arith.constant 0 : index
    %85 = vector.load %arg5[%c2_48, %c0_49, %c0_50] : memref<9x1x256xf32, #tpu.memory_space<vmem>>, vector<1x1x256xf32>
    %86 = vector.shape_cast %85 : vector<1x1x256xf32> to vector<1x256xf32>
    %87 = vector.broadcast %86 : vector<1x256xf32> to vector<8x256xf32>
    %88 = arith.mulf %84, %87 : vector<8x256xf32>
    %c1_i32_51 = arith.constant 1 : i32
    %89 = tpu.dynamic_rotate %19 by %c1_i32_51 dim 1 : vector<8x256xf32>, i32 -> vector<8x256xf32>
    %c3_52 = arith.constant 3 : index
    %c0_53 = arith.constant 0 : index
    %c0_54 = arith.constant 0 : index
    %90 = vector.load %arg5[%c3_52, %c0_53, %c0_54] : memref<9x1x256xf32, #tpu.memory_space<vmem>>, vector<1x1x256xf32>
    %91 = vector.shape_cast %90 : vector<1x1x256xf32> to vector<1x256xf32>
    %92 = vector.broadcast %91 : vector<1x256xf32> to vector<8x256xf32>
    %93 = arith.mulf %89, %92 : vector<8x256xf32>
    %c255_i32_55 = arith.constant 255 : i32
    %94 = tpu.dynamic_rotate %19 by %c255_i32_55 dim 1 : vector<8x256xf32>, i32 -> vector<8x256xf32>
    %c5_56 = arith.constant 5 : index
    %c0_57 = arith.constant 0 : index
    %c0_58 = arith.constant 0 : index
    %95 = vector.load %arg5[%c5_56, %c0_57, %c0_58] : memref<9x1x256xf32, #tpu.memory_space<vmem>>, vector<1x1x256xf32>
    %96 = vector.shape_cast %95 : vector<1x1x256xf32> to vector<1x256xf32>
    %97 = vector.broadcast %96 : vector<1x256xf32> to vector<8x256xf32>
    %98 = arith.mulf %94, %97 : vector<8x256xf32>
    %c241_i32_59 = arith.constant 241 : i32
    %99 = tpu.dynamic_rotate %19 by %c241_i32_59 dim 1 : vector<8x256xf32>, i32 -> vector<8x256xf32>
    %c6_60 = arith.constant 6 : index
    %c0_61 = arith.constant 0 : index
    %c0_62 = arith.constant 0 : index
    %100 = vector.load %arg5[%c6_60, %c0_61, %c0_62] : memref<9x1x256xf32, #tpu.memory_space<vmem>>, vector<1x1x256xf32>
    %101 = vector.shape_cast %100 : vector<1x1x256xf32> to vector<1x256xf32>
    %102 = vector.broadcast %101 : vector<1x256xf32> to vector<8x256xf32>
    %103 = arith.mulf %99, %102 : vector<8x256xf32>
    %c240_i32_63 = arith.constant 240 : i32
    %104 = tpu.dynamic_rotate %19 by %c240_i32_63 dim 1 : vector<8x256xf32>, i32 -> vector<8x256xf32>
    %c7_64 = arith.constant 7 : index
    %c0_65 = arith.constant 0 : index
    %c0_66 = arith.constant 0 : index
    %105 = vector.load %arg5[%c7_64, %c0_65, %c0_66] : memref<9x1x256xf32, #tpu.memory_space<vmem>>, vector<1x1x256xf32>
    %106 = vector.shape_cast %105 : vector<1x1x256xf32> to vector<1x256xf32>
    %107 = vector.broadcast %106 : vector<1x256xf32> to vector<8x256xf32>
    %108 = arith.mulf %104, %107 : vector<8x256xf32>
    %c239_i32_67 = arith.constant 239 : i32
    %109 = tpu.dynamic_rotate %19 by %c239_i32_67 dim 1 : vector<8x256xf32>, i32 -> vector<8x256xf32>
    %c8_68 = arith.constant 8 : index
    %c0_69 = arith.constant 0 : index
    %c0_70 = arith.constant 0 : index
    %110 = vector.load %arg5[%c8_68, %c0_69, %c0_70] : memref<9x1x256xf32, #tpu.memory_space<vmem>>, vector<1x1x256xf32>
    %111 = vector.shape_cast %110 : vector<1x1x256xf32> to vector<1x256xf32>
    %112 = vector.broadcast %111 : vector<1x256xf32> to vector<8x256xf32>
    %113 = arith.mulf %109, %112 : vector<8x256xf32>
    %114 = tpu.concatenate %78, %83, %88, %93, %19, %98, %103, %108, %113 in 0 : vector<8x256xf32>, vector<8x256xf32>, vector<8x256xf32>, vector<8x256xf32>, vector<8x256xf32>, vector<8x256xf32>, vector<8x256xf32>, vector<8x256xf32>, vector<8x256xf32> -> vector<72x256xf32>
    %115 = arith.truncf %114 : vector<72x256xf32> to vector<72x256xbf16>
    %c1_71 = arith.constant 1 : index
    %c0_72 = arith.constant 0 : index
    %c0_73 = arith.constant 0 : index
    %116 = vector.load %arg3[%c1_71, %c0_72, %c0_73] : memref<7x8x72xbf16, #tpu.memory_space<vmem>>, vector<1x8x72xbf16>
    %117 = vector.shape_cast %116 : vector<1x8x72xbf16> to vector<8x72xbf16>
    %cst_74 = arith.constant dense<0.000000e+00> : vector<8x256xf32>
    %118 = tpu.matmul %117, %115, %cst_74 {dimension_numbers = #tpu.dot_dimension_numbers<[1], [0], [0], [1], [0, 0, 1, 1], [], []>} : vector<8x72xbf16>, vector<72x256xbf16>, vector<8x256xf32> -> vector<8x256xf32>
    %c1_75 = arith.constant 1 : index
    %c0_76 = arith.constant 0 : index
    %c0_77 = arith.constant 0 : index
    %119 = vector.load %arg4[%c1_75, %c0_76, %c0_77] : memref<7x8x1xf32, #tpu.memory_space<vmem>>, vector<1x8x1xf32>
    %120 = vector.shape_cast %119 : vector<1x8x1xf32> to vector<8x1xf32>
    %121 = vector.broadcast %120 : vector<8x1xf32> to vector<8x256xf32>
    %122 = arith.addf %118, %121 : vector<8x256xf32>
    %123 = arith.addf %122, %19 : vector<8x256xf32>
    %cst_78 = arith.constant 0.000000e+00 : f32
    %124 = vector.broadcast %cst_78 : f32 to vector<8x256xf32>
    %125 = arith.cmpf oge, %123, %124 : vector<8x256xf32>
    %cst_79 = arith.constant 5.000000e-02 : f32
    %126 = vector.broadcast %cst_79 : f32 to vector<8x256xf32>
    %127 = arith.mulf %126, %123 : vector<8x256xf32>
    %128 = arith.select %125, %123, %127 : vector<8x256xi1>, vector<8x256xf32>
    %c17_i32_80 = arith.constant 17 : i32
    %129 = tpu.dynamic_rotate %128 by %c17_i32_80 dim 1 : vector<8x256xf32>, i32 -> vector<8x256xf32>
    %c0_81 = arith.constant 0 : index
    %c0_82 = arith.constant 0 : index
    %c0_83 = arith.constant 0 : index
    %130 = vector.load %arg5[%c0_81, %c0_82, %c0_83] : memref<9x1x256xf32, #tpu.memory_space<vmem>>, vector<1x1x256xf32>
    %131 = vector.shape_cast %130 : vector<1x1x256xf32> to vector<1x256xf32>
    %132 = vector.broadcast %131 : vector<1x256xf32> to vector<8x256xf32>
    %133 = arith.mulf %129, %132 : vector<8x256xf32>
    %c16_i32_84 = arith.constant 16 : i32
    %134 = tpu.dynamic_rotate %128 by %c16_i32_84 dim 1 : vector<8x256xf32>, i32 -> vector<8x256xf32>
    %c1_85 = arith.constant 1 : index
    %c0_86 = arith.constant 0 : index
    %c0_87 = arith.constant 0 : index
    %135 = vector.load %arg5[%c1_85, %c0_86, %c0_87] : memref<9x1x256xf32, #tpu.memory_space<vmem>>, vector<1x1x256xf32>
    %136 = vector.shape_cast %135 : vector<1x1x256xf32> to vector<1x256xf32>
    %137 = vector.broadcast %136 : vector<1x256xf32> to vector<8x256xf32>
    %138 = arith.mulf %134, %137 : vector<8x256xf32>
    %c15_i32_88 = arith.constant 15 : i32
    %139 = tpu.dynamic_rotate %128 by %c15_i32_88 dim 1 : vector<8x256xf32>, i32 -> vector<8x256xf32>
    %c2_89 = arith.constant 2 : index
    %c0_90 = arith.constant 0 : index
    %c0_91 = arith.constant 0 : index
    %140 = vector.load %arg5[%c2_89, %c0_90, %c0_91] : memref<9x1x256xf32, #tpu.memory_space<vmem>>, vector<1x1x256xf32>
    %141 = vector.shape_cast %140 : vector<1x1x256xf32> to vector<1x256xf32>
    %142 = vector.broadcast %141 : vector<1x256xf32> to vector<8x256xf32>
    %143 = arith.mulf %139, %142 : vector<8x256xf32>
    %c1_i32_92 = arith.constant 1 : i32
    %144 = tpu.dynamic_rotate %128 by %c1_i32_92 dim 1 : vector<8x256xf32>, i32 -> vector<8x256xf32>
    %c3_93 = arith.constant 3 : index
    %c0_94 = arith.constant 0 : index
    %c0_95 = arith.constant 0 : index
    %145 = vector.load %arg5[%c3_93, %c0_94, %c0_95] : memref<9x1x256xf32, #tpu.memory_space<vmem>>, vector<1x1x256xf32>
    %146 = vector.shape_cast %145 : vector<1x1x256xf32> to vector<1x256xf32>
    %147 = vector.broadcast %146 : vector<1x256xf32> to vector<8x256xf32>
    %148 = arith.mulf %144, %147 : vector<8x256xf32>
    %c255_i32_96 = arith.constant 255 : i32
    %149 = tpu.dynamic_rotate %128 by %c255_i32_96 dim 1 : vector<8x256xf32>, i32 -> vector<8x256xf32>
    %c5_97 = arith.constant 5 : index
    %c0_98 = arith.constant 0 : index
    %c0_99 = arith.constant 0 : index
    %150 = vector.load %arg5[%c5_97, %c0_98, %c0_99] : memref<9x1x256xf32, #tpu.memory_space<vmem>>, vector<1x1x256xf32>
    %151 = vector.shape_cast %150 : vector<1x1x256xf32> to vector<1x256xf32>
    %152 = vector.broadcast %151 : vector<1x256xf32> to vector<8x256xf32>
    %153 = arith.mulf %149, %152 : vector<8x256xf32>
    %c241_i32_100 = arith.constant 241 : i32
    %154 = tpu.dynamic_rotate %128 by %c241_i32_100 dim 1 : vector<8x256xf32>, i32 -> vector<8x256xf32>
    %c6_101 = arith.constant 6 : index
    %c0_102 = arith.constant 0 : index
    %c0_103 = arith.constant 0 : index
    %155 = vector.load %arg5[%c6_101, %c0_102, %c0_103] : memref<9x1x256xf32, #tpu.memory_space<vmem>>, vector<1x1x256xf32>
    %156 = vector.shape_cast %155 : vector<1x1x256xf32> to vector<1x256xf32>
    %157 = vector.broadcast %156 : vector<1x256xf32> to vector<8x256xf32>
    %158 = arith.mulf %154, %157 : vector<8x256xf32>
    %c240_i32_104 = arith.constant 240 : i32
    %159 = tpu.dynamic_rotate %128 by %c240_i32_104 dim 1 : vector<8x256xf32>, i32 -> vector<8x256xf32>
    %c7_105 = arith.constant 7 : index
    %c0_106 = arith.constant 0 : index
    %c0_107 = arith.constant 0 : index
    %160 = vector.load %arg5[%c7_105, %c0_106, %c0_107] : memref<9x1x256xf32, #tpu.memory_space<vmem>>, vector<1x1x256xf32>
    %161 = vector.shape_cast %160 : vector<1x1x256xf32> to vector<1x256xf32>
    %162 = vector.broadcast %161 : vector<1x256xf32> to vector<8x256xf32>
    %163 = arith.mulf %159, %162 : vector<8x256xf32>
    %c239_i32_108 = arith.constant 239 : i32
    %164 = tpu.dynamic_rotate %128 by %c239_i32_108 dim 1 : vector<8x256xf32>, i32 -> vector<8x256xf32>
    %c8_109 = arith.constant 8 : index
    %c0_110 = arith.constant 0 : index
    %c0_111 = arith.constant 0 : index
    %165 = vector.load %arg5[%c8_109, %c0_110, %c0_111] : memref<9x1x256xf32, #tpu.memory_space<vmem>>, vector<1x1x256xf32>
    %166 = vector.shape_cast %165 : vector<1x1x256xf32> to vector<1x256xf32>
    %167 = vector.broadcast %166 : vector<1x256xf32> to vector<8x256xf32>
    %168 = arith.mulf %164, %167 : vector<8x256xf32>
    %169 = tpu.concatenate %133, %138, %143, %148, %128, %153, %158, %163, %168 in 0 : vector<8x256xf32>, vector<8x256xf32>, vector<8x256xf32>, vector<8x256xf32>, vector<8x256xf32>, vector<8x256xf32>, vector<8x256xf32>, vector<8x256xf32>, vector<8x256xf32> -> vector<72x256xf32>
    %170 = arith.truncf %169 : vector<72x256xf32> to vector<72x256xbf16>
    %c2_112 = arith.constant 2 : index
    %c0_113 = arith.constant 0 : index
    %c0_114 = arith.constant 0 : index
    %171 = vector.load %arg3[%c2_112, %c0_113, %c0_114] : memref<7x8x72xbf16, #tpu.memory_space<vmem>>, vector<1x8x72xbf16>
    %172 = vector.shape_cast %171 : vector<1x8x72xbf16> to vector<8x72xbf16>
    %cst_115 = arith.constant dense<0.000000e+00> : vector<8x256xf32>
    %173 = tpu.matmul %172, %170, %cst_115 {dimension_numbers = #tpu.dot_dimension_numbers<[1], [0], [0], [1], [0, 0, 1, 1], [], []>} : vector<8x72xbf16>, vector<72x256xbf16>, vector<8x256xf32> -> vector<8x256xf32>
    %c2_116 = arith.constant 2 : index
    %c0_117 = arith.constant 0 : index
    %c0_118 = arith.constant 0 : index
    %174 = vector.load %arg4[%c2_116, %c0_117, %c0_118] : memref<7x8x1xf32, #tpu.memory_space<vmem>>, vector<1x8x1xf32>
    %175 = vector.shape_cast %174 : vector<1x8x1xf32> to vector<8x1xf32>
    %176 = vector.broadcast %175 : vector<8x1xf32> to vector<8x256xf32>
    %177 = arith.addf %173, %176 : vector<8x256xf32>
    %cst_119 = arith.constant 0.000000e+00 : f32
    %178 = vector.broadcast %cst_119 : f32 to vector<8x256xf32>
    %179 = arith.cmpf oge, %177, %178 : vector<8x256xf32>
    %cst_120 = arith.constant 5.000000e-02 : f32
    %180 = vector.broadcast %cst_120 : f32 to vector<8x256xf32>
    %181 = arith.mulf %180, %177 : vector<8x256xf32>
    %182 = arith.select %179, %177, %181 : vector<8x256xi1>, vector<8x256xf32>
    %c17_i32_121 = arith.constant 17 : i32
    %183 = tpu.dynamic_rotate %128 by %c17_i32_121 dim 1 : vector<8x256xf32>, i32 -> vector<8x256xf32>
    %c0_122 = arith.constant 0 : index
    %c0_123 = arith.constant 0 : index
    %c0_124 = arith.constant 0 : index
    %184 = vector.load %arg5[%c0_122, %c0_123, %c0_124] : memref<9x1x256xf32, #tpu.memory_space<vmem>>, vector<1x1x256xf32>
    %185 = vector.shape_cast %184 : vector<1x1x256xf32> to vector<1x256xf32>
    %186 = vector.broadcast %185 : vector<1x256xf32> to vector<8x256xf32>
    %187 = arith.mulf %183, %186 : vector<8x256xf32>
    %c16_i32_125 = arith.constant 16 : i32
    %188 = tpu.dynamic_rotate %128 by %c16_i32_125 dim 1 : vector<8x256xf32>, i32 -> vector<8x256xf32>
    %c1_126 = arith.constant 1 : index
    %c0_127 = arith.constant 0 : index
    %c0_128 = arith.constant 0 : index
    %189 = vector.load %arg5[%c1_126, %c0_127, %c0_128] : memref<9x1x256xf32, #tpu.memory_space<vmem>>, vector<1x1x256xf32>
    %190 = vector.shape_cast %189 : vector<1x1x256xf32> to vector<1x256xf32>
    %191 = vector.broadcast %190 : vector<1x256xf32> to vector<8x256xf32>
    %192 = arith.mulf %188, %191 : vector<8x256xf32>
    %c15_i32_129 = arith.constant 15 : i32
    %193 = tpu.dynamic_rotate %128 by %c15_i32_129 dim 1 : vector<8x256xf32>, i32 -> vector<8x256xf32>
    %c2_130 = arith.constant 2 : index
    %c0_131 = arith.constant 0 : index
    %c0_132 = arith.constant 0 : index
    %194 = vector.load %arg5[%c2_130, %c0_131, %c0_132] : memref<9x1x256xf32, #tpu.memory_space<vmem>>, vector<1x1x256xf32>
    %195 = vector.shape_cast %194 : vector<1x1x256xf32> to vector<1x256xf32>
    %196 = vector.broadcast %195 : vector<1x256xf32> to vector<8x256xf32>
    %197 = arith.mulf %193, %196 : vector<8x256xf32>
    %c1_i32_133 = arith.constant 1 : i32
    %198 = tpu.dynamic_rotate %128 by %c1_i32_133 dim 1 : vector<8x256xf32>, i32 -> vector<8x256xf32>
    %c3_134 = arith.constant 3 : index
    %c0_135 = arith.constant 0 : index
    %c0_136 = arith.constant 0 : index
    %199 = vector.load %arg5[%c3_134, %c0_135, %c0_136] : memref<9x1x256xf32, #tpu.memory_space<vmem>>, vector<1x1x256xf32>
    %200 = vector.shape_cast %199 : vector<1x1x256xf32> to vector<1x256xf32>
    %201 = vector.broadcast %200 : vector<1x256xf32> to vector<8x256xf32>
    %202 = arith.mulf %198, %201 : vector<8x256xf32>
    %c255_i32_137 = arith.constant 255 : i32
    %203 = tpu.dynamic_rotate %128 by %c255_i32_137 dim 1 : vector<8x256xf32>, i32 -> vector<8x256xf32>
    %c5_138 = arith.constant 5 : index
    %c0_139 = arith.constant 0 : index
    %c0_140 = arith.constant 0 : index
    %204 = vector.load %arg5[%c5_138, %c0_139, %c0_140] : memref<9x1x256xf32, #tpu.memory_space<vmem>>, vector<1x1x256xf32>
    %205 = vector.shape_cast %204 : vector<1x1x256xf32> to vector<1x256xf32>
    %206 = vector.broadcast %205 : vector<1x256xf32> to vector<8x256xf32>
    %207 = arith.mulf %203, %206 : vector<8x256xf32>
    %c241_i32_141 = arith.constant 241 : i32
    %208 = tpu.dynamic_rotate %128 by %c241_i32_141 dim 1 : vector<8x256xf32>, i32 -> vector<8x256xf32>
    %c6_142 = arith.constant 6 : index
    %c0_143 = arith.constant 0 : index
    %c0_144 = arith.constant 0 : index
    %209 = vector.load %arg5[%c6_142, %c0_143, %c0_144] : memref<9x1x256xf32, #tpu.memory_space<vmem>>, vector<1x1x256xf32>
    %210 = vector.shape_cast %209 : vector<1x1x256xf32> to vector<1x256xf32>
    %211 = vector.broadcast %210 : vector<1x256xf32> to vector<8x256xf32>
    %212 = arith.mulf %208, %211 : vector<8x256xf32>
    %c240_i32_145 = arith.constant 240 : i32
    %213 = tpu.dynamic_rotate %128 by %c240_i32_145 dim 1 : vector<8x256xf32>, i32 -> vector<8x256xf32>
    %c7_146 = arith.constant 7 : index
    %c0_147 = arith.constant 0 : index
    %c0_148 = arith.constant 0 : index
    %214 = vector.load %arg5[%c7_146, %c0_147, %c0_148] : memref<9x1x256xf32, #tpu.memory_space<vmem>>, vector<1x1x256xf32>
    %215 = vector.shape_cast %214 : vector<1x1x256xf32> to vector<1x256xf32>
    %216 = vector.broadcast %215 : vector<1x256xf32> to vector<8x256xf32>
    %217 = arith.mulf %213, %216 : vector<8x256xf32>
    %c239_i32_149 = arith.constant 239 : i32
    %218 = tpu.dynamic_rotate %128 by %c239_i32_149 dim 1 : vector<8x256xf32>, i32 -> vector<8x256xf32>
    %c8_150 = arith.constant 8 : index
    %c0_151 = arith.constant 0 : index
    %c0_152 = arith.constant 0 : index
    %219 = vector.load %arg5[%c8_150, %c0_151, %c0_152] : memref<9x1x256xf32, #tpu.memory_space<vmem>>, vector<1x1x256xf32>
    %220 = vector.shape_cast %219 : vector<1x1x256xf32> to vector<1x256xf32>
    %221 = vector.broadcast %220 : vector<1x256xf32> to vector<8x256xf32>
    %222 = arith.mulf %218, %221 : vector<8x256xf32>
    %223 = tpu.concatenate %187, %192, %197, %202, %128, %207, %212, %217, %222 in 0 : vector<8x256xf32>, vector<8x256xf32>, vector<8x256xf32>, vector<8x256xf32>, vector<8x256xf32>, vector<8x256xf32>, vector<8x256xf32>, vector<8x256xf32>, vector<8x256xf32> -> vector<72x256xf32>
    %224 = arith.truncf %223 : vector<72x256xf32> to vector<72x256xbf16>
    %c3_153 = arith.constant 3 : index
    %c0_154 = arith.constant 0 : index
    %c0_155 = arith.constant 0 : index
    %225 = vector.load %arg3[%c3_153, %c0_154, %c0_155] : memref<7x8x72xbf16, #tpu.memory_space<vmem>>, vector<1x8x72xbf16>
    %226 = vector.shape_cast %225 : vector<1x8x72xbf16> to vector<8x72xbf16>
    %cst_156 = arith.constant dense<0.000000e+00> : vector<8x256xf32>
    %227 = tpu.matmul %226, %224, %cst_156 {dimension_numbers = #tpu.dot_dimension_numbers<[1], [0], [0], [1], [0, 0, 1, 1], [], []>} : vector<8x72xbf16>, vector<72x256xbf16>, vector<8x256xf32> -> vector<8x256xf32>
    %c3_157 = arith.constant 3 : index
    %c0_158 = arith.constant 0 : index
    %c0_159 = arith.constant 0 : index
    %228 = vector.load %arg4[%c3_157, %c0_158, %c0_159] : memref<7x8x1xf32, #tpu.memory_space<vmem>>, vector<1x8x1xf32>
    %229 = vector.shape_cast %228 : vector<1x8x1xf32> to vector<8x1xf32>
    %230 = vector.broadcast %229 : vector<8x1xf32> to vector<8x256xf32>
    %231 = arith.addf %227, %230 : vector<8x256xf32>
    %232 = arith.addf %231, %128 : vector<8x256xf32>
    %cst_160 = arith.constant 0.000000e+00 : f32
    %233 = vector.broadcast %cst_160 : f32 to vector<8x256xf32>
    %234 = arith.cmpf oge, %232, %233 : vector<8x256xf32>
    %cst_161 = arith.constant 5.000000e-02 : f32
    %235 = vector.broadcast %cst_161 : f32 to vector<8x256xf32>
    %236 = arith.mulf %235, %232 : vector<8x256xf32>
    %237 = arith.select %234, %232, %236 : vector<8x256xi1>, vector<8x256xf32>
    %c17_i32_162 = arith.constant 17 : i32
    %238 = tpu.dynamic_rotate %237 by %c17_i32_162 dim 1 : vector<8x256xf32>, i32 -> vector<8x256xf32>
    %c0_163 = arith.constant 0 : index
    %c0_164 = arith.constant 0 : index
    %c0_165 = arith.constant 0 : index
    %239 = vector.load %arg5[%c0_163, %c0_164, %c0_165] : memref<9x1x256xf32, #tpu.memory_space<vmem>>, vector<1x1x256xf32>
    %240 = vector.shape_cast %239 : vector<1x1x256xf32> to vector<1x256xf32>
    %241 = vector.broadcast %240 : vector<1x256xf32> to vector<8x256xf32>
    %242 = arith.mulf %238, %241 : vector<8x256xf32>
    %c16_i32_166 = arith.constant 16 : i32
    %243 = tpu.dynamic_rotate %237 by %c16_i32_166 dim 1 : vector<8x256xf32>, i32 -> vector<8x256xf32>
    %c1_167 = arith.constant 1 : index
    %c0_168 = arith.constant 0 : index
    %c0_169 = arith.constant 0 : index
    %244 = vector.load %arg5[%c1_167, %c0_168, %c0_169] : memref<9x1x256xf32, #tpu.memory_space<vmem>>, vector<1x1x256xf32>
    %245 = vector.shape_cast %244 : vector<1x1x256xf32> to vector<1x256xf32>
    %246 = vector.broadcast %245 : vector<1x256xf32> to vector<8x256xf32>
    %247 = arith.mulf %243, %246 : vector<8x256xf32>
    %c15_i32_170 = arith.constant 15 : i32
    %248 = tpu.dynamic_rotate %237 by %c15_i32_170 dim 1 : vector<8x256xf32>, i32 -> vector<8x256xf32>
    %c2_171 = arith.constant 2 : index
    %c0_172 = arith.constant 0 : index
    %c0_173 = arith.constant 0 : index
    %249 = vector.load %arg5[%c2_171, %c0_172, %c0_173] : memref<9x1x256xf32, #tpu.memory_space<vmem>>, vector<1x1x256xf32>
    %250 = vector.shape_cast %249 : vector<1x1x256xf32> to vector<1x256xf32>
    %251 = vector.broadcast %250 : vector<1x256xf32> to vector<8x256xf32>
    %252 = arith.mulf %248, %251 : vector<8x256xf32>
    %c1_i32_174 = arith.constant 1 : i32
    %253 = tpu.dynamic_rotate %237 by %c1_i32_174 dim 1 : vector<8x256xf32>, i32 -> vector<8x256xf32>
    %c3_175 = arith.constant 3 : index
    %c0_176 = arith.constant 0 : index
    %c0_177 = arith.constant 0 : index
    %254 = vector.load %arg5[%c3_175, %c0_176, %c0_177] : memref<9x1x256xf32, #tpu.memory_space<vmem>>, vector<1x1x256xf32>
    %255 = vector.shape_cast %254 : vector<1x1x256xf32> to vector<1x256xf32>
    %256 = vector.broadcast %255 : vector<1x256xf32> to vector<8x256xf32>
    %257 = arith.mulf %253, %256 : vector<8x256xf32>
    %c255_i32_178 = arith.constant 255 : i32
    %258 = tpu.dynamic_rotate %237 by %c255_i32_178 dim 1 : vector<8x256xf32>, i32 -> vector<8x256xf32>
    %c5_179 = arith.constant 5 : index
    %c0_180 = arith.constant 0 : index
    %c0_181 = arith.constant 0 : index
    %259 = vector.load %arg5[%c5_179, %c0_180, %c0_181] : memref<9x1x256xf32, #tpu.memory_space<vmem>>, vector<1x1x256xf32>
    %260 = vector.shape_cast %259 : vector<1x1x256xf32> to vector<1x256xf32>
    %261 = vector.broadcast %260 : vector<1x256xf32> to vector<8x256xf32>
    %262 = arith.mulf %258, %261 : vector<8x256xf32>
    %c241_i32_182 = arith.constant 241 : i32
    %263 = tpu.dynamic_rotate %237 by %c241_i32_182 dim 1 : vector<8x256xf32>, i32 -> vector<8x256xf32>
    %c6_183 = arith.constant 6 : index
    %c0_184 = arith.constant 0 : index
    %c0_185 = arith.constant 0 : index
    %264 = vector.load %arg5[%c6_183, %c0_184, %c0_185] : memref<9x1x256xf32, #tpu.memory_space<vmem>>, vector<1x1x256xf32>
    %265 = vector.shape_cast %264 : vector<1x1x256xf32> to vector<1x256xf32>
    %266 = vector.broadcast %265 : vector<1x256xf32> to vector<8x256xf32>
    %267 = arith.mulf %263, %266 : vector<8x256xf32>
    %c240_i32_186 = arith.constant 240 : i32
    %268 = tpu.dynamic_rotate %237 by %c240_i32_186 dim 1 : vector<8x256xf32>, i32 -> vector<8x256xf32>
    %c7_187 = arith.constant 7 : index
    %c0_188 = arith.constant 0 : index
    %c0_189 = arith.constant 0 : index
    %269 = vector.load %arg5[%c7_187, %c0_188, %c0_189] : memref<9x1x256xf32, #tpu.memory_space<vmem>>, vector<1x1x256xf32>
    %270 = vector.shape_cast %269 : vector<1x1x256xf32> to vector<1x256xf32>
    %271 = vector.broadcast %270 : vector<1x256xf32> to vector<8x256xf32>
    %272 = arith.mulf %268, %271 : vector<8x256xf32>
    %c239_i32_190 = arith.constant 239 : i32
    %273 = tpu.dynamic_rotate %237 by %c239_i32_190 dim 1 : vector<8x256xf32>, i32 -> vector<8x256xf32>
    %c8_191 = arith.constant 8 : index
    %c0_192 = arith.constant 0 : index
    %c0_193 = arith.constant 0 : index
    %274 = vector.load %arg5[%c8_191, %c0_192, %c0_193] : memref<9x1x256xf32, #tpu.memory_space<vmem>>, vector<1x1x256xf32>
    %275 = vector.shape_cast %274 : vector<1x1x256xf32> to vector<1x256xf32>
    %276 = vector.broadcast %275 : vector<1x256xf32> to vector<8x256xf32>
    %277 = arith.mulf %273, %276 : vector<8x256xf32>
    %278 = tpu.concatenate %242, %247, %252, %257, %237, %262, %267, %272, %277 in 0 : vector<8x256xf32>, vector<8x256xf32>, vector<8x256xf32>, vector<8x256xf32>, vector<8x256xf32>, vector<8x256xf32>, vector<8x256xf32>, vector<8x256xf32>, vector<8x256xf32> -> vector<72x256xf32>
    %279 = arith.truncf %278 : vector<72x256xf32> to vector<72x256xbf16>
    %c4 = arith.constant 4 : index
    %c0_194 = arith.constant 0 : index
    %c0_195 = arith.constant 0 : index
    %280 = vector.load %arg3[%c4, %c0_194, %c0_195] : memref<7x8x72xbf16, #tpu.memory_space<vmem>>, vector<1x8x72xbf16>
    %281 = vector.shape_cast %280 : vector<1x8x72xbf16> to vector<8x72xbf16>
    %cst_196 = arith.constant dense<0.000000e+00> : vector<8x256xf32>
    %282 = tpu.matmul %281, %279, %cst_196 {dimension_numbers = #tpu.dot_dimension_numbers<[1], [0], [0], [1], [0, 0, 1, 1], [], []>} : vector<8x72xbf16>, vector<72x256xbf16>, vector<8x256xf32> -> vector<8x256xf32>
    %c4_197 = arith.constant 4 : index
    %c0_198 = arith.constant 0 : index
    %c0_199 = arith.constant 0 : index
    %283 = vector.load %arg4[%c4_197, %c0_198, %c0_199] : memref<7x8x1xf32, #tpu.memory_space<vmem>>, vector<1x8x1xf32>
    %284 = vector.shape_cast %283 : vector<1x8x1xf32> to vector<8x1xf32>
    %285 = vector.broadcast %284 : vector<8x1xf32> to vector<8x256xf32>
    %286 = arith.addf %282, %285 : vector<8x256xf32>
    %cst_200 = arith.constant 0.000000e+00 : f32
    %287 = vector.broadcast %cst_200 : f32 to vector<8x256xf32>
    %288 = arith.cmpf oge, %286, %287 : vector<8x256xf32>
    %cst_201 = arith.constant 5.000000e-02 : f32
    %289 = vector.broadcast %cst_201 : f32 to vector<8x256xf32>
    %290 = arith.mulf %289, %286 : vector<8x256xf32>
    %291 = arith.select %288, %286, %290 : vector<8x256xi1>, vector<8x256xf32>
    %c17_i32_202 = arith.constant 17 : i32
    %292 = tpu.dynamic_rotate %237 by %c17_i32_202 dim 1 : vector<8x256xf32>, i32 -> vector<8x256xf32>
    %c0_203 = arith.constant 0 : index
    %c0_204 = arith.constant 0 : index
    %c0_205 = arith.constant 0 : index
    %293 = vector.load %arg5[%c0_203, %c0_204, %c0_205] : memref<9x1x256xf32, #tpu.memory_space<vmem>>, vector<1x1x256xf32>
    %294 = vector.shape_cast %293 : vector<1x1x256xf32> to vector<1x256xf32>
    %295 = vector.broadcast %294 : vector<1x256xf32> to vector<8x256xf32>
    %296 = arith.mulf %292, %295 : vector<8x256xf32>
    %c16_i32_206 = arith.constant 16 : i32
    %297 = tpu.dynamic_rotate %237 by %c16_i32_206 dim 1 : vector<8x256xf32>, i32 -> vector<8x256xf32>
    %c1_207 = arith.constant 1 : index
    %c0_208 = arith.constant 0 : index
    %c0_209 = arith.constant 0 : index
    %298 = vector.load %arg5[%c1_207, %c0_208, %c0_209] : memref<9x1x256xf32, #tpu.memory_space<vmem>>, vector<1x1x256xf32>
    %299 = vector.shape_cast %298 : vector<1x1x256xf32> to vector<1x256xf32>
    %300 = vector.broadcast %299 : vector<1x256xf32> to vector<8x256xf32>
    %301 = arith.mulf %297, %300 : vector<8x256xf32>
    %c15_i32_210 = arith.constant 15 : i32
    %302 = tpu.dynamic_rotate %237 by %c15_i32_210 dim 1 : vector<8x256xf32>, i32 -> vector<8x256xf32>
    %c2_211 = arith.constant 2 : index
    %c0_212 = arith.constant 0 : index
    %c0_213 = arith.constant 0 : index
    %303 = vector.load %arg5[%c2_211, %c0_212, %c0_213] : memref<9x1x256xf32, #tpu.memory_space<vmem>>, vector<1x1x256xf32>
    %304 = vector.shape_cast %303 : vector<1x1x256xf32> to vector<1x256xf32>
    %305 = vector.broadcast %304 : vector<1x256xf32> to vector<8x256xf32>
    %306 = arith.mulf %302, %305 : vector<8x256xf32>
    %c1_i32_214 = arith.constant 1 : i32
    %307 = tpu.dynamic_rotate %237 by %c1_i32_214 dim 1 : vector<8x256xf32>, i32 -> vector<8x256xf32>
    %c3_215 = arith.constant 3 : index
    %c0_216 = arith.constant 0 : index
    %c0_217 = arith.constant 0 : index
    %308 = vector.load %arg5[%c3_215, %c0_216, %c0_217] : memref<9x1x256xf32, #tpu.memory_space<vmem>>, vector<1x1x256xf32>
    %309 = vector.shape_cast %308 : vector<1x1x256xf32> to vector<1x256xf32>
    %310 = vector.broadcast %309 : vector<1x256xf32> to vector<8x256xf32>
    %311 = arith.mulf %307, %310 : vector<8x256xf32>
    %c255_i32_218 = arith.constant 255 : i32
    %312 = tpu.dynamic_rotate %237 by %c255_i32_218 dim 1 : vector<8x256xf32>, i32 -> vector<8x256xf32>
    %c5_219 = arith.constant 5 : index
    %c0_220 = arith.constant 0 : index
    %c0_221 = arith.constant 0 : index
    %313 = vector.load %arg5[%c5_219, %c0_220, %c0_221] : memref<9x1x256xf32, #tpu.memory_space<vmem>>, vector<1x1x256xf32>
    %314 = vector.shape_cast %313 : vector<1x1x256xf32> to vector<1x256xf32>
    %315 = vector.broadcast %314 : vector<1x256xf32> to vector<8x256xf32>
    %316 = arith.mulf %312, %315 : vector<8x256xf32>
    %c241_i32_222 = arith.constant 241 : i32
    %317 = tpu.dynamic_rotate %237 by %c241_i32_222 dim 1 : vector<8x256xf32>, i32 -> vector<8x256xf32>
    %c6_223 = arith.constant 6 : index
    %c0_224 = arith.constant 0 : index
    %c0_225 = arith.constant 0 : index
    %318 = vector.load %arg5[%c6_223, %c0_224, %c0_225] : memref<9x1x256xf32, #tpu.memory_space<vmem>>, vector<1x1x256xf32>
    %319 = vector.shape_cast %318 : vector<1x1x256xf32> to vector<1x256xf32>
    %320 = vector.broadcast %319 : vector<1x256xf32> to vector<8x256xf32>
    %321 = arith.mulf %317, %320 : vector<8x256xf32>
    %c240_i32_226 = arith.constant 240 : i32
    %322 = tpu.dynamic_rotate %237 by %c240_i32_226 dim 1 : vector<8x256xf32>, i32 -> vector<8x256xf32>
    %c7_227 = arith.constant 7 : index
    %c0_228 = arith.constant 0 : index
    %c0_229 = arith.constant 0 : index
    %323 = vector.load %arg5[%c7_227, %c0_228, %c0_229] : memref<9x1x256xf32, #tpu.memory_space<vmem>>, vector<1x1x256xf32>
    %324 = vector.shape_cast %323 : vector<1x1x256xf32> to vector<1x256xf32>
    %325 = vector.broadcast %324 : vector<1x256xf32> to vector<8x256xf32>
    %326 = arith.mulf %322, %325 : vector<8x256xf32>
    %c239_i32_230 = arith.constant 239 : i32
    %327 = tpu.dynamic_rotate %237 by %c239_i32_230 dim 1 : vector<8x256xf32>, i32 -> vector<8x256xf32>
    %c8_231 = arith.constant 8 : index
    %c0_232 = arith.constant 0 : index
    %c0_233 = arith.constant 0 : index
    %328 = vector.load %arg5[%c8_231, %c0_232, %c0_233] : memref<9x1x256xf32, #tpu.memory_space<vmem>>, vector<1x1x256xf32>
    %329 = vector.shape_cast %328 : vector<1x1x256xf32> to vector<1x256xf32>
    %330 = vector.broadcast %329 : vector<1x256xf32> to vector<8x256xf32>
    %331 = arith.mulf %327, %330 : vector<8x256xf32>
    %332 = tpu.concatenate %296, %301, %306, %311, %237, %316, %321, %326, %331 in 0 : vector<8x256xf32>, vector<8x256xf32>, vector<8x256xf32>, vector<8x256xf32>, vector<8x256xf32>, vector<8x256xf32>, vector<8x256xf32>, vector<8x256xf32>, vector<8x256xf32> -> vector<72x256xf32>
    %333 = arith.truncf %332 : vector<72x256xf32> to vector<72x256xbf16>
    %c5_234 = arith.constant 5 : index
    %c0_235 = arith.constant 0 : index
    %c0_236 = arith.constant 0 : index
    %334 = vector.load %arg3[%c5_234, %c0_235, %c0_236] : memref<7x8x72xbf16, #tpu.memory_space<vmem>>, vector<1x8x72xbf16>
    %335 = vector.shape_cast %334 : vector<1x8x72xbf16> to vector<8x72xbf16>
    %cst_237 = arith.constant dense<0.000000e+00> : vector<8x256xf32>
    %336 = tpu.matmul %335, %333, %cst_237 {dimension_numbers = #tpu.dot_dimension_numbers<[1], [0], [0], [1], [0, 0, 1, 1], [], []>} : vector<8x72xbf16>, vector<72x256xbf16>, vector<8x256xf32> -> vector<8x256xf32>
    %c5_238 = arith.constant 5 : index
    %c0_239 = arith.constant 0 : index
    %c0_240 = arith.constant 0 : index
    %337 = vector.load %arg4[%c5_238, %c0_239, %c0_240] : memref<7x8x1xf32, #tpu.memory_space<vmem>>, vector<1x8x1xf32>
    %338 = vector.shape_cast %337 : vector<1x8x1xf32> to vector<8x1xf32>
    %339 = vector.broadcast %338 : vector<8x1xf32> to vector<8x256xf32>
    %340 = arith.addf %336, %339 : vector<8x256xf32>
    %341 = arith.addf %340, %237 : vector<8x256xf32>
    %cst_241 = arith.constant 0.000000e+00 : f32
    %342 = vector.broadcast %cst_241 : f32 to vector<8x256xf32>
    %343 = arith.cmpf oge, %341, %342 : vector<8x256xf32>
    %cst_242 = arith.constant 5.000000e-02 : f32
    %344 = vector.broadcast %cst_242 : f32 to vector<8x256xf32>
    %345 = arith.mulf %344, %341 : vector<8x256xf32>
    %346 = arith.select %343, %341, %345 : vector<8x256xi1>, vector<8x256xf32>
    %c17_i32_243 = arith.constant 17 : i32
    %347 = tpu.dynamic_rotate %346 by %c17_i32_243 dim 1 : vector<8x256xf32>, i32 -> vector<8x256xf32>
    %c0_244 = arith.constant 0 : index
    %c0_245 = arith.constant 0 : index
    %c0_246 = arith.constant 0 : index
    %348 = vector.load %arg5[%c0_244, %c0_245, %c0_246] : memref<9x1x256xf32, #tpu.memory_space<vmem>>, vector<1x1x256xf32>
    %349 = vector.shape_cast %348 : vector<1x1x256xf32> to vector<1x256xf32>
    %350 = vector.broadcast %349 : vector<1x256xf32> to vector<8x256xf32>
    %351 = arith.mulf %347, %350 : vector<8x256xf32>
    %c16_i32_247 = arith.constant 16 : i32
    %352 = tpu.dynamic_rotate %346 by %c16_i32_247 dim 1 : vector<8x256xf32>, i32 -> vector<8x256xf32>
    %c1_248 = arith.constant 1 : index
    %c0_249 = arith.constant 0 : index
    %c0_250 = arith.constant 0 : index
    %353 = vector.load %arg5[%c1_248, %c0_249, %c0_250] : memref<9x1x256xf32, #tpu.memory_space<vmem>>, vector<1x1x256xf32>
    %354 = vector.shape_cast %353 : vector<1x1x256xf32> to vector<1x256xf32>
    %355 = vector.broadcast %354 : vector<1x256xf32> to vector<8x256xf32>
    %356 = arith.mulf %352, %355 : vector<8x256xf32>
    %c15_i32_251 = arith.constant 15 : i32
    %357 = tpu.dynamic_rotate %346 by %c15_i32_251 dim 1 : vector<8x256xf32>, i32 -> vector<8x256xf32>
    %c2_252 = arith.constant 2 : index
    %c0_253 = arith.constant 0 : index
    %c0_254 = arith.constant 0 : index
    %358 = vector.load %arg5[%c2_252, %c0_253, %c0_254] : memref<9x1x256xf32, #tpu.memory_space<vmem>>, vector<1x1x256xf32>
    %359 = vector.shape_cast %358 : vector<1x1x256xf32> to vector<1x256xf32>
    %360 = vector.broadcast %359 : vector<1x256xf32> to vector<8x256xf32>
    %361 = arith.mulf %357, %360 : vector<8x256xf32>
    %c1_i32_255 = arith.constant 1 : i32
    %362 = tpu.dynamic_rotate %346 by %c1_i32_255 dim 1 : vector<8x256xf32>, i32 -> vector<8x256xf32>
    %c3_256 = arith.constant 3 : index
    %c0_257 = arith.constant 0 : index
    %c0_258 = arith.constant 0 : index
    %363 = vector.load %arg5[%c3_256, %c0_257, %c0_258] : memref<9x1x256xf32, #tpu.memory_space<vmem>>, vector<1x1x256xf32>
    %364 = vector.shape_cast %363 : vector<1x1x256xf32> to vector<1x256xf32>
    %365 = vector.broadcast %364 : vector<1x256xf32> to vector<8x256xf32>
    %366 = arith.mulf %362, %365 : vector<8x256xf32>
    %c255_i32_259 = arith.constant 255 : i32
    %367 = tpu.dynamic_rotate %346 by %c255_i32_259 dim 1 : vector<8x256xf32>, i32 -> vector<8x256xf32>
    %c5_260 = arith.constant 5 : index
    %c0_261 = arith.constant 0 : index
    %c0_262 = arith.constant 0 : index
    %368 = vector.load %arg5[%c5_260, %c0_261, %c0_262] : memref<9x1x256xf32, #tpu.memory_space<vmem>>, vector<1x1x256xf32>
    %369 = vector.shape_cast %368 : vector<1x1x256xf32> to vector<1x256xf32>
    %370 = vector.broadcast %369 : vector<1x256xf32> to vector<8x256xf32>
    %371 = arith.mulf %367, %370 : vector<8x256xf32>
    %c241_i32_263 = arith.constant 241 : i32
    %372 = tpu.dynamic_rotate %346 by %c241_i32_263 dim 1 : vector<8x256xf32>, i32 -> vector<8x256xf32>
    %c6_264 = arith.constant 6 : index
    %c0_265 = arith.constant 0 : index
    %c0_266 = arith.constant 0 : index
    %373 = vector.load %arg5[%c6_264, %c0_265, %c0_266] : memref<9x1x256xf32, #tpu.memory_space<vmem>>, vector<1x1x256xf32>
    %374 = vector.shape_cast %373 : vector<1x1x256xf32> to vector<1x256xf32>
    %375 = vector.broadcast %374 : vector<1x256xf32> to vector<8x256xf32>
    %376 = arith.mulf %372, %375 : vector<8x256xf32>
    %c240_i32_267 = arith.constant 240 : i32
    %377 = tpu.dynamic_rotate %346 by %c240_i32_267 dim 1 : vector<8x256xf32>, i32 -> vector<8x256xf32>
    %c7_268 = arith.constant 7 : index
    %c0_269 = arith.constant 0 : index
    %c0_270 = arith.constant 0 : index
    %378 = vector.load %arg5[%c7_268, %c0_269, %c0_270] : memref<9x1x256xf32, #tpu.memory_space<vmem>>, vector<1x1x256xf32>
    %379 = vector.shape_cast %378 : vector<1x1x256xf32> to vector<1x256xf32>
    %380 = vector.broadcast %379 : vector<1x256xf32> to vector<8x256xf32>
    %381 = arith.mulf %377, %380 : vector<8x256xf32>
    %c239_i32_271 = arith.constant 239 : i32
    %382 = tpu.dynamic_rotate %346 by %c239_i32_271 dim 1 : vector<8x256xf32>, i32 -> vector<8x256xf32>
    %c8_272 = arith.constant 8 : index
    %c0_273 = arith.constant 0 : index
    %c0_274 = arith.constant 0 : index
    %383 = vector.load %arg5[%c8_272, %c0_273, %c0_274] : memref<9x1x256xf32, #tpu.memory_space<vmem>>, vector<1x1x256xf32>
    %384 = vector.shape_cast %383 : vector<1x1x256xf32> to vector<1x256xf32>
    %385 = vector.broadcast %384 : vector<1x256xf32> to vector<8x256xf32>
    %386 = arith.mulf %382, %385 : vector<8x256xf32>
    %387 = tpu.concatenate %351, %356, %361, %366, %346, %371, %376, %381, %386 in 0 : vector<8x256xf32>, vector<8x256xf32>, vector<8x256xf32>, vector<8x256xf32>, vector<8x256xf32>, vector<8x256xf32>, vector<8x256xf32>, vector<8x256xf32>, vector<8x256xf32> -> vector<72x256xf32>
    %388 = arith.truncf %387 : vector<72x256xf32> to vector<72x256xbf16>
    %c6_275 = arith.constant 6 : index
    %c0_276 = arith.constant 0 : index
    %c0_277 = arith.constant 0 : index
    %389 = vector.load %arg3[%c6_275, %c0_276, %c0_277] : memref<7x8x72xbf16, #tpu.memory_space<vmem>>, vector<1x8x72xbf16>
    %390 = vector.shape_cast %389 : vector<1x8x72xbf16> to vector<8x72xbf16>
    %cst_278 = arith.constant dense<0.000000e+00> : vector<8x256xf32>
    %391 = tpu.matmul %390, %388, %cst_278 {dimension_numbers = #tpu.dot_dimension_numbers<[1], [0], [0], [1], [0, 0, 1, 1], [], []>} : vector<8x72xbf16>, vector<72x256xbf16>, vector<8x256xf32> -> vector<8x256xf32>
    %c6_279 = arith.constant 6 : index
    %c0_280 = arith.constant 0 : index
    %c0_281 = arith.constant 0 : index
    %392 = vector.load %arg4[%c6_279, %c0_280, %c0_281] : memref<7x8x1xf32, #tpu.memory_space<vmem>>, vector<1x8x1xf32>
    %393 = vector.shape_cast %392 : vector<1x8x1xf32> to vector<8x1xf32>
    %394 = vector.broadcast %393 : vector<8x1xf32> to vector<8x256xf32>
    %395 = arith.addf %391, %394 : vector<8x256xf32>
    %cst_282 = arith.constant 0.000000e+00 : f32
    %396 = vector.broadcast %cst_282 : f32 to vector<8x256xf32>
    %397 = arith.cmpf oge, %395, %396 : vector<8x256xf32>
    %cst_283 = arith.constant 5.000000e-02 : f32
    %398 = vector.broadcast %cst_283 : f32 to vector<8x256xf32>
    %399 = arith.mulf %398, %395 : vector<8x256xf32>
    %400 = arith.select %397, %395, %399 : vector<8x256xi1>, vector<8x256xf32>
    %401 = tpu.concatenate %73, %182, %291, %400 in 0 : vector<8x256xf32>, vector<8x256xf32>, vector<8x256xf32>, vector<8x256xf32> -> vector<32x256xf32>
    %402 = arith.truncf %401 : vector<32x256xf32> to vector<32x256xbf16>
    %c0_284 = arith.constant 0 : index
    %c0_285 = arith.constant 0 : index
    %403 = vector.load %arg6[%c0_284, %c0_285] : memref<8x32xbf16, #tpu.memory_space<vmem>>, vector<8x32xbf16>
    %cst_286 = arith.constant dense<0.000000e+00> : vector<8x256xf32>
    %404 = tpu.matmul %403, %402, %cst_286 {dimension_numbers = #tpu.dot_dimension_numbers<[1], [0], [0], [1], [0, 0, 1, 1], [], []>} : vector<8x32xbf16>, vector<32x256xbf16>, vector<8x256xf32> -> vector<8x256xf32>
    %c0_287 = arith.constant 0 : index
    %c0_288 = arith.constant 0 : index
    %405 = vector.load %arg7[%c0_287, %c0_288] : memref<8x1xf32, #tpu.memory_space<vmem>>, vector<8x1xf32>
    %406 = vector.broadcast %405 : vector<8x1xf32> to vector<8x256xf32>
    %407 = arith.addf %404, %406 : vector<8x256xf32>
    %cst_289 = arith.constant 0.000000e+00 : f32
    %408 = vector.broadcast %cst_289 : f32 to vector<8x256xf32>
    %409 = arith.subf %408, %407 : vector<8x256xf32>
    %410 = math.exp %409 : vector<8x256xf32>
    %cst_290 = arith.constant 1.000000e+00 : f32
    %411 = vector.broadcast %cst_290 : f32 to vector<8x256xf32>
    %412 = arith.addf %411, %410 : vector<8x256xf32>
    %cst_291 = arith.constant 1.000000e+00 : f32
    %413 = vector.broadcast %cst_291 : f32 to vector<8x256xf32>
    %414 = arith.divf %413, %412 : vector<8x256xf32>
    %cst_292 = arith.constant 9.99999974E-5 : f32
    %cst_293 = arith.constant 1.000000e+00 : f32
    %415 = vector.broadcast %cst_292 : f32 to vector<8x256xf32>
    %416 = arith.maximumf %415, %414 : vector<8x256xf32>
    %417 = vector.broadcast %cst_293 : f32 to vector<8x256xf32>
    %418 = arith.minimumf %417, %416 : vector<8x256xf32>
    %419 = arith.divf %1, %418 : vector<8x256xf32>
    %cst_294 = arith.constant 0.000000e+00 : f32
    %cst_295 = arith.constant 1.000000e+00 : f32
    %420 = vector.broadcast %cst_294 : f32 to vector<8x256xf32>
    %421 = arith.maximumf %420, %419 : vector<8x256xf32>
    %422 = vector.broadcast %cst_295 : f32 to vector<8x256xf32>
    %423 = arith.minimumf %422, %421 : vector<8x256xf32>
    %c0_296 = arith.constant 0 : index
    %c0_297 = arith.constant 0 : index
    %c0_298 = arith.constant 0 : index
    %424 = vector.load %arg8[%c0_296, %c0_297, %c0_298] : memref<1x8x256xf32, #tpu.memory_space<vmem>>, vector<1x8x256xf32>
    %425 = vector.shape_cast %424 : vector<1x8x256xf32> to vector<8x256xf32>
    %426 = vector.shape_cast %423 : vector<8x256xf32> to vector<1x8x256xf32>
    tpu.vector_store %arg8[%c0_296, %c0_297, %c0_298], %426 {strides = array<i32>} : memref<1x8x256xf32, #tpu.memory_space<vmem>>, vector<1x8x256xf32>,
    %c0_299 = arith.constant 0 : index
    %c0_300 = arith.constant 0 : index
    %c0_301 = arith.constant 0 : index
    %427 = vector.load %arg9[%c0_299, %c0_300, %c0_301] : memref<1x8x256xf32, #tpu.memory_space<vmem>>, vector<1x8x256xf32>
    %428 = vector.shape_cast %427 : vector<1x8x256xf32> to vector<8x256xf32>
    %429 = vector.shape_cast %418 : vector<8x256xf32> to vector<1x8x256xf32>
    tpu.vector_store %arg9[%c0_299, %c0_300, %c0_301], %429 {strides = array<i32>} : memref<1x8x256xf32, #tpu.memory_space<vmem>>, vector<1x8x256xf32>,
    return
  }
  func.func @transform_0(%arg0: i32) -> (i32, i32, i32) {
    %c0_i32 = arith.constant 0 : i32
    %c0_i32_0 = arith.constant 0 : i32
    %c0_i32_1 = arith.constant 0 : i32
    return %arg0, %c0_i32, %c0_i32_0 : i32, i32, i32
  }
  func.func @transform_1(%arg0: i32) -> (i32, i32, i32) {
    %c0_i32 = arith.constant 0 : i32
    %c0_i32_0 = arith.constant 0 : i32
    %c0_i32_1 = arith.constant 0 : i32
    return %arg0, %c0_i32, %c0_i32_0 : i32, i32, i32
  }
  func.func @transform_2(%arg0: i32) -> (i32, i32, i32) {
    %c0_i32 = arith.constant 0 : i32
    %c0_i32_0 = arith.constant 0 : i32
    %c0_i32_1 = arith.constant 0 : i32
    %c0_i32_2 = arith.constant 0 : i32
    return %c0_i32, %c0_i32_0, %c0_i32_1 : i32, i32, i32
  }
  func.func @transform_3(%arg0: i32) -> (i32, i32, i32) {
    %c0_i32 = arith.constant 0 : i32
    %c0_i32_0 = arith.constant 0 : i32
    %c0_i32_1 = arith.constant 0 : i32
    %c0_i32_2 = arith.constant 0 : i32
    return %c0_i32, %c0_i32_0, %c0_i32_1 : i32, i32, i32
  }
  func.func @transform_4(%arg0: i32) -> (i32, i32, i32) {
    %c0_i32 = arith.constant 0 : i32
    %c0_i32_0 = arith.constant 0 : i32
    %c0_i32_1 = arith.constant 0 : i32
    %c0_i32_2 = arith.constant 0 : i32
    return %c0_i32, %c0_i32_0, %c0_i32_1 : i32, i32, i32
  }
  func.func @transform_5(%arg0: i32) -> (i32, i32) {
    %c0_i32 = arith.constant 0 : i32
    %c0_i32_0 = arith.constant 0 : i32
    %c0_i32_1 = arith.constant 0 : i32
    return %c0_i32, %c0_i32_0 : i32, i32
  }
  func.func @transform_6(%arg0: i32) -> (i32, i32) {
    %c0_i32 = arith.constant 0 : i32
    %c0_i32_0 = arith.constant 0 : i32
    %c0_i32_1 = arith.constant 0 : i32
    return %c0_i32, %c0_i32_0 : i32, i32
  }
  func.func @transform_7(%arg0: i32) -> (i32, i32, i32) {
    %c0_i32 = arith.constant 0 : i32
    %c0_i32_0 = arith.constant 0 : i32
    %c0_i32_1 = arith.constant 0 : i32
    return %arg0, %c0_i32, %c0_i32_0 : i32, i32, i32
  }
  func.func @transform_8(%arg0: i32) -> (i32, i32, i32) {
    %c0_i32 = arith.constant 0 : i32
    %c0_i32_0 = arith.constant 0 : i32
    %c0_i32_1 = arith.constant 0 : i32
    return %arg0, %c0_i32, %c0_i32_0 : i32, i32, i32
  }
}

</mosaic_0001>

<bundles_post_ra>
// kernel: tpu_custom_call.1
= control target key start
LH: loop header
LB: loop body
LE: loop exit
PB: predicated region body
PF: predicated region fallthrough
CT: control target
= control target key end

     0   :  { %14 = vsyncpa [#allocation3], 0  ;;  %s2501_s0 = inlined_call_operand.vmem [shape: f32[2,8,256], index: 0, kind: input, shape index: {}]   ;;  %s2502_s1 = inlined_call_operand.vmem [shape: f32[2,8,256], index: 1, kind: input, shape index: {}]   ;;  %s2503_s2 = inlined_call_operand.hbm [shape: bf16[7,8,72], index: 2, kind: input, shape index: {}]   ;;  %s2504_s3 = inlined_call_operand.vmem [shape: f32[7,8,1], index: 3, kind: input, shape index: {}]   ;;  %s2505_s4 = inlined_call_operand.vmem [shape: f32[9,1,256], index: 4, kind: input, shape index: {}]   ;;  %s2506_s5 = inlined_call_operand.vmem [shape: bf16[8,32], index: 5, kind: input, shape index: {}]   ;;  %s2507_s6 = inlined_call_operand.vmem [shape: f32[8,1], index: 6, kind: input, shape index: {}]   ;;  %s2508_s7 = inlined_call_operand.hbm [shape: f32[2,8,256], index: 7, kind: output, shape index: {0}]   ;;  %s2509_s8 = inlined_call_operand.hbm [shape: f32[2,8,256], index: 8, kind: output, shape index: {1}]  }
   0x1   :  { %15 = vsyncpa [#allocation4], 0 }
   0x2   :  { %17 = vsyncpa [#allocation4 + $0x1], 0 }
   0x3   :  { %18 = vsyncpa [#allocation7], 0 }
   0x4   :  { %20 = vsyncpa [#allocation7 + $0x1], 0  ;;  %s1786_s26 = smov 0   ;;  %s1788_s27 = smov 0  }
   0x5   :  { %s1790_s28 = smov 0   ;;  %s1792_s29 = smov 0  }
   0x6 LB: > { %s1807_s30 = sadd.s32 4294967295, %s1725_s29   ;;  %s1468_s9 = sadd.s32 4294967294, %s1725_s29   ;;  %s1725_s29 = sphi %s1792_s29, %s2530_s29   ;;  %s1721_s28 = sphi %s1790_s28, %s2529_s28   ;;  %s1717_s27 = sphi %s1788_s27, %s2528_s27   ;;  %s1713_s26 = sphi %s1786_s26, %s2527_s26  }
   0x7   : > { %s1811_s10 = sadd.s32 1, %s1725_s29   ;;  %s190_s11 = sadd.s32 1, %s1721_s28 }
   0x8   : > { %s187_s12 = ssub.s32 %s1725_s29, %s1811_s10  ;;  %p200_p0 = scmp.ne.s32.totalorder %s1721_s28, %s1717_s27 }
   0x9   : > { %p188_p1 = scmp.eq.s32.totalorder %s187_s12, 0  ;;  %p201_p2 = scmp.eq.s32.totalorder %s1807_s30, 1 }
   0xa   : > { %p206_p3 = scmp.ne.s32.totalorder %s1717_s27, %s1713_s26  ;;  %p207_p4 = scmp.eq.s32.totalorder %s1468_s9, 1 }
   0xb   : > { %s1822_s13 = scalar_select %p188_p1, %s1721_s28, %s190_s11  }
   0xc   : > { %p1824_p5 = por %p201_p2, %p200_p0  ;;  %p1828_p6 = por %p207_p4, %p206_p3 }
   0xd   : > { %p1469_p7 = scmp.ge.s32.totalorder %s1725_s29, 1  ;;  %p240_p8 = scmp.lt.s32.totalorder %s1725_s29, 3 }
   0xe   : > { %s2516_s14 = scalar_select %p1824_p5, 1, 0 }
   0xf   : > { %s2517_s15 = scalar_select %p1828_p6, 1, 0 }
  0x10   : > { %p2510_p9 = scmp.eq.s32.totalorder %s1807_s30, 0  ;;  %p1835_p10 = pnand %p1469_p7, %p240_p8 }
  0x11   : > { %s1727_s17 = smov [#allocation2]   ;;  %s1599_s22 = scalar_lea.hbm %s2503_s2, 448 }
  0x12   : > { %s2518_s16 = scalar_select %p1835_p10, 1, 0 }
  0x13   : > { %s252_s18 = sshll.u32 %s1727_s17, 4  ;;  %p1525_p11 = pneg %p1835_p10  ;;  %s253_s18 = int_to_ptr.vmem [resolvable:$true] %s252_s18 }
  0x14   : > { %p1600_p13 = scmp.ne.s32.totalorder %s2503_s2, %s1599_s22  ;;  %p1606_p3 = scmp.lt.u32.totalorder %s1599_s22, %s2503_s2 }
  0x15   : > { %p1843_p12 = pnand %p2510_p9, %p1525_p11 }
  0x17   : > { %p1601_p0 = pneg %p1843_p12 }
  0x19   : > { %p1602_p1 = pnand %p1601_p0, %p1600_p13 }
  0x1b   : > { %p1603_p2 = pneg %p1602_p1 }
  0x1d   : > { %p1608_p4 = pnand %p1606_p3, %p1603_p2 }
  0x1f   : > { %1611 = shalt.err (!%p1608_p4)
}
  0x20   : > { %s1612_s9 = scalar_lea.vmem %s253_s18, 448  ;;  %p1620_p9 = scmp.lt.s32.totalorder %s253_s18, %s253_s18 }
  0x21   : > { %p1613_p7 = scmp.ne.s32.totalorder %s253_s18, %s1612_s9  ;;  %p1621_p6 = scmp.lt.s32.totalorder %s1612_s9, %s1612_s9 }
  0x23   : > { %p1615_p8 = pnand %p1613_p7, %p1601_p0  ;;  %p1622_p5 = por %p1621_p6, %p1620_p9 }
  0x25   : > { %p1616_p11 = pneg %p1615_p8 }
  0x27   : > { %p1623_p10 = pnand %p1622_p5, %p1616_p11 }
  0x29   : > { %1626 = shalt.err (!%p1623_p10)
}
  0x2a   : > { %s1728_s11 = smov 64   ;;  %s1729_s12 = smov 4  }
  0x2b   : > { %1528 = dma.hbm_to_vmem [thread:$0]  (!%p1843_p12), %s2503_s2, 448, %s253_s18, [#allocation3], %s1728_s11, %s1728_s11, %s1729_s12  }
  0x2c   : > { %p2520_p13 = scmp.ne.s32.totalorder %s2518_s16, 0 }
  0x2d   : > { %p2521_p1 = scmp.eq.s32.totalorder (!%p2520_p13), %s1807_s30, 0 }
  0x2e   : > { %296 = sbr.rel (%p2520_p13) target bundleno = 1970 (0x7b2), region = 48 }
  0x35   : > { %1700 = dma.done.wait (%p2521_p1), [#allocation3], 448   ;;  %p2522_p0 = pmov %p2521_p1 }
  0x36   : > { %p340_p5 = scmp.lt.s32.totalorder %s1807_s30, 1  ;;  %s1730_s16 = smov 112   ;;  %v357_v2 = vlaneseq  ;;  %v1478_v7 = vld [vmem:[%s2505_s4 + $0xa] sm:$0x3]  ;;  %v1479_v10 = vld [vmem:[%s2505_s4 + $0xe] sm:$0x3] }
  0x37   : > { %1702 = vsyncadd (%p2522_p0), [#allocation3], 4294966848  ;;  %s1731_s18 = smov 127   ;;  %s1732_s25 = smov 111   ;;  %v1480_v13 = vld [vmem:[%s2505_s4 + $0x10] sm:$0x3] }
  0x38   : > { %s341_s21 = scalar_select %p340_p5, %s1807_s30, 1  ;;  %v366_v3 = vshrl.u32 %v357_v2, 7  ;;  %v1884_v4 = vand.u32 127, %v357_v2  ;;  %v1738_v40 = vmov 0   ;;  %v1487_v41 = vld [vmem:[%s2504_s3 + $0x8] sm:$0xff]  ;;  %vm581_vm8 = vcmask 1043456  }
  0x39   : > { %s1735_s23 = smov 15   ;;  %s1736_s19 = smov 1   ;;  %679 = vmatprep.mubr.bf16.mxu1 %v1738_v40  ;;  %1583 = vset.pattern.permute.xlu0 %v1738_v40  ;;  %v434_v42 = vld [vmem:[%s2505_s4] sm:$0x3]  ;;  %v1481_v43 = vld [vmem:[%s2505_s4 + $0x2] sm:$0x3] }
  0x3a   : > { %s1514_s22 = sshll.u32 %s341_s21, 4  ;;  %v1886_v5 = vsub.s32 0, %v366_v3  ;;  %v1888_v6 = vsub.s32 1, %v366_v3  ;;  %vm383_vm0 = vcmp.lt.s32.totalorder %v1884_v4, 112  ;;  %vm359_vm1 = vcmp.lt.s32.totalorder %v1884_v4, 127  ;;  %s1733_s21 = smov 17   ;;  %620 = vmatprep.mubr.bf16.mxu0 %v1738_v40  ;;  %1584 = vset.pattern.permute.xlu1 %v1738_v40 }
  0x3b   : > { %s1874_s24 = scalar_lea.vmem %s2501_s0, %s1514_s22  ;;  %vm407_vm2 = vcmp.lt.s32.totalorder %v1884_v4, 111  ;;  %s1734_s22 = smov 16   ;;  %vm431_vm3 = vcmp.lt.s32.totalorder %v1884_v4, 17  ;;  %vm452_vm4 = vcmp.lt.s32.totalorder %v1884_v4, 16  ;;  %v1482_v60 = vld [vmem:[%s2505_s4 + $0x4] sm:$0x3] }
  0x3c   : > { %v351_v0 = vld [vmem:[%s1874_s24] sm:$0xff]  ;;  %v352_v1 = vld [vmem:[%s1874_s24 + $0x8] sm:$0xff]  ;;  %v1899_v11 = vrot.slane %v1478_v7, %v1886_v5  ;;  %v1902_v12 = vrot.slane %v1478_v7, %v1888_v6  ;;  %v1908_v14 = vrot.slane %v1479_v10, %v1886_v5  ;;  %v1911_v15 = vrot.slane %v1479_v10, %v1888_v6  ;;  %s2513_s1 = smov 113   ;;  %s2412_s17 = sand.u32 1, %s1717_s27  }
  0x3d   : > { %379 = vrot.lane.b32.xlu1 %v351_v0, %s1730_s16  ;;  %353 = vrot.lane.b32.xlu0 %v351_v0, %s1731_s18  ;;  %v1925_v24 = vrot.slane %v1480_v13, %v1886_v5  ;;  %v1928_v25 = vrot.slane %v1480_v13, %v1888_v6  ;;  %v1989_v46 = vrot.slane %v434_v42, %v1886_v5  ;;  %v1483_v61 = vld [vmem:[%s2505_s4 + $0x6] sm:$0x3]  ;;  %vm474_vm5 = vcmp.lt.s32.totalorder %v1884_v4, 15  ;;  %s1325_s20 = scalar_lea.sflag [#allocation7], %s2412_s17  ;;  %p2524_p9 = scmp.ne.s32.totalorder %s2516_s14, 0 }
  0x3e   : > { %v1992_v47 = vrot.slane %v434_v42, %v1888_v6  ;;  %v1996_v48 = vrot.slane %v1481_v43, %v1886_v5  ;;  %v1999_v49 = vrot.slane %v1481_v43, %v1888_v6  ;;  %v2021_v2 = vrot.slane %v1482_v60, %v1886_v5  ;;  %s1739_s9 = smov [#allocation6]  }
  0x3f   : > { %v2024_v3 = vrot.slane %v1482_v60, %v1888_v6  ;;  %vm496_vm6 = vcmp.lt.s32.totalorder %v1884_v4, 1  ;;  %v2028_v7 = vrot.slane %v1483_v61, %v1886_v5  ;;  %vm526_vm7 = vcmp.lt.s32.totalorder %v1884_v4, 113  ;;  %s1631_s11 = sshll.u32 %s1739_s9, 4  ;;  %s1632_s11 = int_to_ptr.vmem [resolvable:$false] %s1631_s11 }
  0x40   : > { %vm577_vm9 = vcmask 588800   ;;  %s1633_s12 = scalar_lea.vmem %s1632_s11, 512 }
  0x41   : > { %381 = vrot.lane.b32.xlu1 %v352_v1, %s1730_s16  ;;  %355 = vrot.lane.b32.xlu0 %v352_v1, %s1731_s18 }
  0x45   : > { %405 = vrot.lane.b32.xlu1 %v352_v1, %s1732_s25  ;;  %403 = vrot.lane.b32.xlu0 %v351_v0, %s1732_s25 }
  0xaf   : > { %v380_v8 = vpop.permute.xlu1 %379  ;;  %v354_v9 = vpop.permute.xlu0 %353 }
  0xb3   : > { %v382_v16 = vpop.permute.xlu1 %381  ;;  %v356_v17 = vpop.permute.xlu0 %355 }
  0xb4   : > { %v384_v18 = vsel %vm383_vm0, %v380_v8, %v382_v16  ;;  %v385_v19 = vsel %vm383_vm0, %v382_v16, %v380_v8  ;;  %v360_v20 = vsel %vm359_vm1, %v354_v9, %v356_v17  ;;  %v361_v21 = vsel %vm359_vm1, %v356_v17, %v354_v9 }
  0xb5   : > { %v375_v22 = vmul.f32 %v1899_v11, %v360_v20  ;;  %v376_v23 = vmul.f32 %v1902_v12, %v361_v21  ;;  %v399_v26 = vmul.f32 %v1908_v14, %v384_v18  ;;  %v400_v27 = vmul.f32 %v1911_v15, %v385_v19 }
  0xb6   : > { %v2031_v8 = vrot.slane %v1483_v61, %v1888_v6 }
  0xb7   : > { %v377_v28 = vmax.f32 %v351_v0, %v375_v22  ;;  %v378_v29 = vmax.f32 %v352_v1, %v376_v23  ;;  %v406_v30 = vpop.permute.xlu1 %405  ;;  %v404_v31 = vpop.permute.xlu0 %403 }
  0xb8   : > { %v408_v32 = vsel %vm407_vm2, %v404_v31, %v406_v30  ;;  %v409_v33 = vsel %vm407_vm2, %v406_v30, %v404_v31 }
  0xb9   : > { %v401_v34 = vmax.f32 %v377_v28, %v399_v26  ;;  %v402_v35 = vmax.f32 %v378_v29, %v400_v27  ;;  %v423_v36 = vmul.f32 %v1925_v24, %v408_v32  ;;  %v424_v37 = vmul.f32 %v1928_v25, %v409_v33  ;;  %v1484_v33 = vld [vmem:[%s2505_s4 + $0xc] sm:$0x3] }
  0xba   : > { %v2061_v42 = vrot.slane %v1484_v33, %v1888_v6 }
  0xbb   : > { %v1938_v38 = vmax.f32 %v401_v34, %v423_v36  ;;  %v1940_v39 = vmax.f32 %v402_v35, %v424_v37 }
  0xbd   : > { %429 = vrot.lane.b32.xlu1 %v1940_v39, %s1733_s21  ;;  %427 = vrot.lane.b32.xlu0 %v1938_v38, %s1733_s21 }
  0xc1   : > { %450 = vrot.lane.b32.xlu1 %v1940_v39, %s1734_s22  ;;  %448 = vrot.lane.b32.xlu0 %v1938_v38, %s1734_s22 }
  0xc5   : > { %472 = vrot.lane.b32.xlu1 %v1940_v39, %s1735_s23  ;;  %470 = vrot.lane.b32.xlu0 %v1938_v38, %s1735_s23 }
  0xc9   : > { %494 = vrot.lane.b32.xlu1 %v1940_v39, %s1736_s19  ;;  %492 = vrot.lane.b32.xlu0 %v1938_v38, %s1736_s19 }
  0xcd   : > { %516 = vrot.lane.b32.xlu1 %v1940_v39, %s1731_s18  ;;  %514 = vrot.lane.b32.xlu0 %v1938_v38, %s1731_s18 }
  0xd1   : > { %524 = vrot.lane.b32.xlu1 %v1940_v39, %s2513_s1  ;;  %522 = vrot.lane.b32.xlu0 %v1938_v38, %s2513_s1  ;;  %s2523_s1 = smov 113  }
  0xd5   : > { %546 = vrot.lane.b32.xlu1 %v1940_v39, %s1730_s16  ;;  %544 = vrot.lane.b32.xlu0 %v1938_v38, %s1730_s16 }
  0xd9   : > { %554 = vrot.lane.b32.xlu1 %v1940_v39, %s1732_s25  ;;  %552 = vrot.lane.b32.xlu0 %v1938_v38, %s1732_s25 }
  0xdd   : > { %641 = vperm.xlu0 %1583, %v1487_v41   ;;  %v2058_v41 = vrot.slane %v1484_v33, %v1886_v5 }
 0x12f   : > { %v430_v44 = vpop.permute.xlu1 %429  ;;  %v428_v45 = vpop.permute.xlu0 %427 }
 0x130   : > { %v432_v50 = vsel %vm431_vm3, %v428_v45, %v430_v44  ;;  %v433_v51 = vsel %vm431_vm3, %v430_v44, %v428_v45 }
 0x131   : > { %v446_v56 = vmul.f32 %v1989_v46, %v433_v51  ;;  %v447_v57 = vmul.f32 %v1992_v47, %v432_v50 }
 0x133   : > { %v451_v52 = vpop.permute.xlu1 %450  ;;  %v449_v53 = vpop.permute.xlu0 %448 }
 0x134   : > { %v453_v54 = vsel %vm452_vm4, %v449_v53, %v451_v52  ;;  %v454_v55 = vsel %vm452_vm4, %v451_v52, %v449_v53 }
 0x135   : > { %v468_v58 = vmul.f32 %v1996_v48, %v454_v55  ;;  %v469_v59 = vmul.f32 %v1999_v49, %v453_v54 }
 0x137   : > { %v473_v62 = vpop.permute.xlu1 %472  ;;  %v471_v63 = vpop.permute.xlu0 %470  ;;  %v561_v0 = vpack.c.bf16 %v469_v59, %v447_v57  ;;  %v560_v1 = vpack.c.bf16 %v468_v58, %v446_v56 }
 0x138   : > { %v475_v9 = vsel %vm474_vm5, %v471_v63, %v473_v62  ;;  %v476_v10 = vsel %vm474_vm5, %v473_v62, %v471_v63 }
 0x139   : > { %588 = vmatprep.subr.bf16.mxu0 %v561_v0  ;;  %647 = vmatprep.subr.bf16.mxu1 %v561_v0  ;;  %v490_v19 = vmul.f32 %v2021_v2, %v476_v10  ;;  %v491_v20 = vmul.f32 %v2024_v3, %v475_v9  ;;  %v636_v9 = vld [vmem:[#allocation2 + $0x4] sm:$0xf] }
 0x13a   : > { %589 = vmatpush1.bf16.msra.mxu0 %v560_v1  ;;  %648 = vmatpush1.bf16.msra.mxu1 %v560_v1 }
 0x13b   : > { %v495_v13 = vpop.permute.xlu1 %494  ;;  %v493_v16 = vpop.permute.xlu0 %492 }
 0x13c   : > { %v497_v17 = vsel %vm496_vm6, %v493_v16, %v495_v13  ;;  %v498_v18 = vsel %vm496_vm6, %v495_v13, %v493_v16 }
 0x13d   : > { %v512_v21 = vmul.f32 %v2028_v7, %v498_v18  ;;  %v513_v22 = vmul.f32 %v2031_v8, %v497_v17 }
 0x13f   : > { %v517_v23 = vpop.permute.xlu1 %516  ;;  %v515_v26 = vpop.permute.xlu0 %514  ;;  %v563_v27 = vpack.c.bf16 %v513_v22, %v491_v20  ;;  %v562_v28 = vpack.c.bf16 %v512_v21, %v490_v19 }
 0x140   : > { %v518_v29 = vsel %vm359_vm1, %v515_v26, %v517_v23  ;;  %v519_v30 = vsel %vm359_vm1, %v517_v23, %v515_v26 }
 0x141   : > { %v520_v31 = vmul.f32 %v518_v29, %v1899_v11  ;;  %v521_v32 = vmul.f32 %v519_v30, %v1902_v12  ;;  %590 = vmatprep.subr.bf16.mxu0 %v563_v27  ;;  %649 = vmatprep.subr.bf16.mxu1 %v563_v27 }
 0x142   : > { %591 = vmatpush1.bf16.msra.mxu0 %v562_v28  ;;  %650 = vmatpush1.bf16.msra.mxu1 %v562_v28  ;;  %v570_v28 = vld [vmem:[#allocation2] sm:$0xf] }
 0x143   : > { %v525_v34 = vpop.permute.xlu1 %524  ;;  %v523_v35 = vpop.permute.xlu0 %522  ;;  %v565_v36 = vpack.c.bf16 %v521_v32, %v1940_v39  ;;  %v564_v37 = vpack.c.bf16 %v520_v31, %v1938_v38 }
 0x144   : > { %v527_v43 = vsel %vm526_vm7, %v523_v35, %v525_v34  ;;  %v528_v44 = vsel %vm526_vm7, %v525_v34, %v523_v35 }
 0x145   : > { %592 = vmatprep.subr.bf16.mxu0 %v565_v36  ;;  %651 = vmatprep.subr.bf16.mxu1 %v565_v36  ;;  %v542_v6 = vmul.f32 %v2058_v41, %v527_v43  ;;  %v543_v52 = vmul.f32 %v2061_v42, %v528_v44 }
 0x146   : > { %593 = vmatpush1.bf16.msra.mxu0 %v564_v37  ;;  %652 = vmatpush1.bf16.msra.mxu1 %v564_v37 }
 0x147   : > { %v547_v45 = vpop.permute.xlu1 %546  ;;  %v545_v50 = vpop.permute.xlu0 %544 }
 0x148   : > { %v548_v51 = vsel %vm383_vm0, %v545_v50, %v547_v45  ;;  %v549_v5 = vsel %vm383_vm0, %v547_v45, %v545_v50 }
 0x149   : > { %v550_v53 = vmul.f32 %v548_v51, %v1908_v14  ;;  %v551_v54 = vmul.f32 %v549_v5, %v1911_v15 }
 0x14b   : > { %v555_v55 = vpop.permute.xlu1 %554  ;;  %v553_v56 = vpop.permute.xlu0 %552  ;;  %v567_v57 = vpack.c.bf16 %v551_v54, %v543_v52  ;;  %v566_v58 = vpack.c.bf16 %v550_v53, %v542_v6 }
 0x14c   : > { %v556_v59 = vsel %vm407_vm2, %v553_v56, %v555_v55  ;;  %v557_v60 = vsel %vm407_vm2, %v555_v55, %v553_v56 }
 0x14d   : > { %v558_v61 = vmul.f32 %v556_v59, %v1925_v24  ;;  %v559_v62 = vmul.f32 %v557_v60, %v1928_v25  ;;  %594 = vmatprep.subr.bf16.mxu0 %v567_v57  ;;  %653 = vmatprep.subr.bf16.mxu1 %v567_v57 }
 0x14e   : > { %595 = vmatpush1.bf16.msra.mxu0 %v566_v58  ;;  %654 = vmatpush1.bf16.msra.mxu1 %v566_v58 }
 0x14f   : > { %v568_v63 = vpack.c.bf16 %v558_v61, %v558_v61  ;;  %v569_v0 = vpack.c.bf16 %v559_v62, %v559_v62 }
 0x151   : > { %1485 = vmatprep.subr.msk.bf16.mxu0 %vm581_vm8, %v569_v0  ;;  %1488 = vmatprep.subr.msk.bf16.mxu1 %vm581_vm8, %v569_v0  ;;  %v583_v1 = vsel %vm581_vm8, %v568_v63, 0 }
 0x152   : > { %597 = vmatpush1.bf16.msra.mxu0 %v583_v1  ;;  %656 = vmatpush1.bf16.msra.mxu1 %v583_v1 }
 0x155   : > { %1489 = vmatmul.mubr.msk.bf16.vlgmr.msra.gmra.mrb[0].mxu1 %vm577_vm9, %v636_v9  ;;  %1486 = vmatmul.mubr.msk.bf16.vlgmr.msra.gmra.mrb[0].mxu0 %vm577_vm9, %v570_v28 }
 0x156   : > { %879 = vmatprep.mubr.bf16.mxu1 %v1738_v40  ;;  %820 = vmatprep.mubr.bf16.mxu0 %v1738_v40 }
 0x15c   : > { %v642_v10 = vpop.permute.xlu0 %641 }
 0x228   : > { %v681_v13 = vpop.f32.mrb[0].mxu1 }
 0x229   : > { %v682_v16 = vadd.f32 %v681_v13, %v642_v10  ;;  %v683_v17 = vpop.f32.mrb[1].mxu1 }
 0x22a   : > { %v684_v18 = vadd.f32 %v683_v17, %v642_v10  ;;  %v685_v19 = vpop.f32.mrb[2].mxu1 }
 0x22b   : > { %v688_v20 = vadd.f32 %v682_v16, %v1938_v38  ;;  %v686_v21 = vpop.f32.mrb[3].mxu1 }
 0x22c   : > { %v689_v22 = vadd.f32 %v684_v18, %v1940_v39  ;;  %v1493_v39 = vld [vmem:[%s2504_s3 + $0x18] sm:$0xff] }
 0x22d   : > { %vm690_vm10 = vcmp.ge.f32.partialorder %v688_v20, 0.0  ;;  %v692_v23 = vmul.f32 0.05, %v688_v20 }
 0x22e   : > { %v693_v27 = vmul.f32 0.05, %v689_v22  ;;  %vm691_vm11 = vcmp.ge.f32.partialorder %v689_v22, 0.0 }
 0x22f   : > { %v2088_v26 = vsel %vm690_vm10, %v688_v20, %v692_v23 }
 0x230   : > { %704 = vrot.lane.b32.xlu0 %v2088_v26, %s1734_s22  ;;  %696 = vrot.lane.b32.xlu1 %v2088_v26, %s1733_s21  ;;  %v2096_v38 = vsel %vm691_vm11, %v689_v22, %v693_v27 }
 0x234   : > { %712 = vrot.lane.b32.xlu0 %v2088_v26, %s1735_s23  ;;  %698 = vrot.lane.b32.xlu1 %v2096_v38, %s1733_s21 }
 0x238   : > { %720 = vrot.lane.b32.xlu0 %v2088_v26, %s1736_s19  ;;  %706 = vrot.lane.b32.xlu1 %v2096_v38, %s1734_s22 }
 0x23c   : > { %728 = vrot.lane.b32.xlu0 %v2088_v26, %s1731_s18  ;;  %714 = vrot.lane.b32.xlu1 %v2096_v38, %s1735_s23 }
 0x240   : > { %736 = vrot.lane.b32.xlu0 %v2088_v26, %s2523_s1  ;;  %722 = vrot.lane.b32.xlu1 %v2096_v38, %s1736_s19 }
 0x244   : > { %744 = vrot.lane.b32.xlu0 %v2088_v26, %s1730_s16  ;;  %730 = vrot.lane.b32.xlu1 %v2096_v38, %s1731_s18 }
 0x248   : > { %752 = vrot.lane.b32.xlu0 %v2088_v26, %s1732_s25  ;;  %738 = vrot.lane.b32.xlu1 %v2096_v38, %s2523_s1 }
 0x24c   : > { %841 = vperm.xlu0 %1583, %v1493_v39   ;;  %746 = vrot.lane.b32.xlu1 %v2096_v38, %s1730_s16 }
 0x250   : > { %754 = vrot.lane.b32.xlu1 %v2096_v38, %s1732_s25 }
 0x2a2   : > { %v705_v29 = vpop.permute.xlu0 %704  ;;  %v697_v30 = vpop.permute.xlu1 %696 }
 0x2a6   : > { %v713_v31 = vpop.permute.xlu0 %712  ;;  %v699_v32 = vpop.permute.xlu1 %698 }
 0x2a7   : > { %v700_v33 = vsel %vm431_vm3, %v697_v30, %v699_v32  ;;  %v701_v34 = vsel %vm431_vm3, %v699_v32, %v697_v30 }
 0x2a8   : > { %v702_v44 = vmul.f32 %v701_v34, %v1989_v46  ;;  %v703_v45 = vmul.f32 %v700_v33, %v1992_v47 }
 0x2aa   : > { %v721_v35 = vpop.permute.xlu0 %720  ;;  %v707_v36 = vpop.permute.xlu1 %706 }
 0x2ab   : > { %v708_v37 = vsel %vm452_vm4, %v705_v29, %v707_v36  ;;  %v709_v43 = vsel %vm452_vm4, %v707_v36, %v705_v29 }
 0x2ac   : > { %v710_v50 = vmul.f32 %v709_v43, %v1996_v48  ;;  %v711_v51 = vmul.f32 %v708_v37, %v1999_v49 }
 0x2ae   : > { %v760_v5 = vpack.c.bf16 %v710_v50, %v702_v44  ;;  %v715_v6 = vpop.permute.xlu1 %714  ;;  %v761_v52 = vpack.c.bf16 %v711_v51, %v703_v45  ;;  %v729_v53 = vpop.permute.xlu0 %728 }
 0x2af   : > { %v716_v54 = vsel %vm474_vm5, %v713_v31, %v715_v6  ;;  %v717_v55 = vsel %vm474_vm5, %v715_v6, %v713_v31  ;;  %v836_v6 = vld [vmem:[#allocation2 + $0xc] sm:$0xf] }
 0x2b0   : > { %788 = vmatprep.subr.bf16.mxu0 %v761_v52  ;;  %847 = vmatprep.subr.bf16.mxu1 %v761_v52  ;;  %v718_v59 = vmul.f32 %v717_v55, %v2021_v2  ;;  %v719_v60 = vmul.f32 %v716_v54, %v2024_v3 }
 0x2b1   : > { %789 = vmatpush1.bf16.msra.mxu0 %v760_v5  ;;  %848 = vmatpush1.bf16.msra.mxu1 %v760_v5 }
 0x2b2   : > { %v723_v56 = vpop.permute.xlu1 %722  ;;  %v737_v63 = vpop.permute.xlu0 %736 }
 0x2b3   : > { %v724_v57 = vsel %vm496_vm6, %v721_v35, %v723_v56  ;;  %v725_v58 = vsel %vm496_vm6, %v723_v56, %v721_v35 }
 0x2b4   : > { %v726_v61 = vmul.f32 %v725_v58, %v2028_v7  ;;  %v727_v62 = vmul.f32 %v724_v57, %v2031_v8 }
 0x2b6   : > { %v762_v0 = vpack.c.bf16 %v726_v61, %v718_v59  ;;  %v731_v1 = vpop.permute.xlu1 %730  ;;  %v763_v9 = vpack.c.bf16 %v727_v62, %v719_v60  ;;  %v745_v21 = vpop.permute.xlu0 %744  ;;  %v771_v62 = vld [vmem:[#allocation2 + $0x8] sm:$0xf] }
 0x2b7   : > { %v732_v10 = vsel %vm359_vm1, %v729_v53, %v731_v1  ;;  %v733_v13 = vsel %vm359_vm1, %v731_v1, %v729_v53 }
 0x2b8   : > { %v734_v16 = vmul.f32 %v732_v10, %v1899_v11  ;;  %v735_v17 = vmul.f32 %v733_v13, %v1902_v12  ;;  %790 = vmatprep.subr.bf16.mxu0 %v763_v9  ;;  %849 = vmatprep.subr.bf16.mxu1 %v763_v9 }
 0x2b9   : > { %791 = vmatpush1.bf16.msra.mxu0 %v762_v0  ;;  %850 = vmatpush1.bf16.msra.mxu1 %v762_v0 }
 0x2ba   : > { %v764_v18 = vpack.c.bf16 %v734_v16, %v2088_v26  ;;  %v739_v19 = vpop.permute.xlu1 %738  ;;  %v765_v20 = vpack.c.bf16 %v735_v17, %v2096_v38  ;;  %v753_v33 = vpop.permute.xlu0 %752 }
 0x2bb   : > { %v740_v22 = vsel %vm526_vm7, %v737_v63, %v739_v19  ;;  %v741_v23 = vsel %vm526_vm7, %v739_v19, %v737_v63 }
 0x2bc   : > { %792 = vmatprep.subr.bf16.mxu0 %v765_v20  ;;  %851 = vmatprep.subr.bf16.mxu1 %v765_v20  ;;  %v742_v29 = vmul.f32 %v740_v22, %v2058_v41  ;;  %v743_v30 = vmul.f32 %v741_v23, %v2061_v42 }
 0x2bd   : > { %793 = vmatpush1.bf16.msra.mxu0 %v764_v18  ;;  %852 = vmatpush1.bf16.msra.mxu1 %v764_v18 }
 0x2be   : > { %v747_v27 = vpop.permute.xlu1 %746 }
 0x2bf   : > { %v748_v28 = vsel %vm383_vm0, %v745_v21, %v747_v27  ;;  %v749_v39 = vsel %vm383_vm0, %v747_v27, %v745_v21 }
 0x2c0   : > { %v750_v31 = vmul.f32 %v748_v28, %v1908_v14  ;;  %v751_v32 = vmul.f32 %v749_v39, %v1911_v15 }
 0x2c2   : > { %v766_v34 = vpack.c.bf16 %v750_v31, %v742_v29  ;;  %v755_v35 = vpop.permute.xlu1 %754  ;;  %v767_v36 = vpack.c.bf16 %v751_v32, %v743_v30 }
 0x2c3   : > { %v756_v37 = vsel %vm407_vm2, %v753_v33, %v755_v35  ;;  %v757_v43 = vsel %vm407_vm2, %v755_v35, %v753_v33 }
 0x2c4   : > { %v758_v44 = vmul.f32 %v756_v37, %v1925_v24  ;;  %v759_v45 = vmul.f32 %v757_v43, %v1928_v25  ;;  %794 = vmatprep.subr.bf16.mxu0 %v767_v36  ;;  %853 = vmatprep.subr.bf16.mxu1 %v767_v36 }
 0x2c5   : > { %795 = vmatpush1.bf16.msra.mxu0 %v766_v34  ;;  %854 = vmatpush1.bf16.msra.mxu1 %v766_v34 }
 0x2c6   : > { %v768_v50 = vpack.c.bf16 %v758_v44, %v758_v44  ;;  %v769_v51 = vpack.c.bf16 %v759_v45, %v759_v45 }
 0x2c8   : > { %1491 = vmatprep.subr.msk.bf16.mxu0 %vm581_vm8, %v769_v51  ;;  %1494 = vmatprep.subr.msk.bf16.mxu1 %vm581_vm8, %v769_v51  ;;  %v783_v5 = vsel %vm581_vm8, %v768_v50, 0 }
 0x2c9   : > { %797 = vmatpush1.bf16.msra.mxu0 %v783_v5  ;;  %856 = vmatpush1.bf16.msra.mxu1 %v783_v5 }
 0x2cb   : > { %v842_v52 = vpop.permute.xlu0 %841 }
 0x2cc   : > { %1495 = vmatmul.mubr.msk.bf16.vlgmr.msra.gmra.mrb[4].mxu1 %vm577_vm9, %v836_v6  ;;  %1492 = vmatmul.mubr.msk.bf16.vlgmr.msra.gmra.mrb[4].mxu0 %vm577_vm9, %v771_v62 }
 0x2cd   : > { %1079 = vmatprep.mubr.bf16.mxu1 %v1738_v40  ;;  %1020 = vmatprep.mubr.bf16.mxu0 %v1738_v40 }
 0x39f   : > { %v881_v53 = vpop.f32.mrb[4].mxu1 }
 0x3a0   : > { %v882_v54 = vadd.f32 %v881_v53, %v842_v52  ;;  %v883_v55 = vpop.f32.mrb[5].mxu1 }
 0x3a1   : > { %v884_v56 = vadd.f32 %v883_v55, %v842_v52  ;;  %v885_v57 = vpop.f32.mrb[6].mxu1 }
 0x3a2   : > { %v888_v58 = vadd.f32 %v882_v54, %v2088_v26  ;;  %v886_v59 = vpop.f32.mrb[7].mxu1  ;;  %v1499_v26 = vld [vmem:[%s2504_s3 + $0x28] sm:$0xff] }
 0x3a3   : > { %v889_v60 = vadd.f32 %v884_v56, %v2096_v38 }
 0x3a4   : > { %vm890_vm12 = vcmp.ge.f32.partialorder %v888_v58, 0.0  ;;  %v892_v61 = vmul.f32 0.05, %v888_v58 }
 0x3a5   : > { %vm891_vm13 = vcmp.ge.f32.partialorder %v889_v60, 0.0  ;;  %v893_v63 = vmul.f32 0.05, %v889_v60 }
 0x3a6   : > { %v2187_v0 = vsel %vm890_vm12, %v888_v58, %v892_v61 }
 0x3a7   : > { %v2190_v1 = vsel %vm891_vm13, %v889_v60, %v893_v63  ;;  %896 = vrot.lane.b32.xlu1 %v2187_v0, %s1733_s21 }
 0x3a8   : > { %898 = vrot.lane.b32.xlu0 %v2190_v1, %s1733_s21 }
 0x3ab   : > { %904 = vrot.lane.b32.xlu1 %v2187_v0, %s1734_s22 }
 0x3ac   : > { %906 = vrot.lane.b32.xlu0 %v2190_v1, %s1734_s22 }
 0x3af   : > { %912 = vrot.lane.b32.xlu1 %v2187_v0, %s1735_s23 }
 0x3b0   : > { %914 = vrot.lane.b32.xlu0 %v2190_v1, %s1735_s23 }
 0x3b3   : > { %920 = vrot.lane.b32.xlu1 %v2187_v0, %s1736_s19 }
 0x3b4   : > { %922 = vrot.lane.b32.xlu0 %v2190_v1, %s1736_s19 }
 0x3b7   : > { %928 = vrot.lane.b32.xlu1 %v2187_v0, %s1731_s18 }
 0x3b8   : > { %930 = vrot.lane.b32.xlu0 %v2190_v1, %s1731_s18 }
 0x3bb   : > { %936 = vrot.lane.b32.xlu1 %v2187_v0, %s2523_s1 }
 0x3bc   : > { %938 = vrot.lane.b32.xlu0 %v2190_v1, %s2523_s1 }
 0x3bf   : > { %944 = vrot.lane.b32.xlu1 %v2187_v0, %s1730_s16 }
 0x3c0   : > { %946 = vrot.lane.b32.xlu0 %v2190_v1, %s1730_s16 }
 0x3c3   : > { %952 = vrot.lane.b32.xlu1 %v2187_v0, %s1732_s25 }
 0x3c4   : > { %954 = vrot.lane.b32.xlu0 %v2190_v1, %s1732_s25 }
 0x3c7   : > { %1041 = vperm.xlu1 %1584, %v1499_v26  }
 0x419   : > { %v897_v38 = vpop.permute.xlu1 %896 }
 0x41a   : > { %v899_v9 = vpop.permute.xlu0 %898 }
 0x41b   : > { %v900_v10 = vsel %vm431_vm3, %v897_v38, %v899_v9  ;;  %v901_v13 = vsel %vm431_vm3, %v899_v9, %v897_v38 }
 0x41c   : > { %v902_v20 = vmul.f32 %v901_v13, %v1989_v46  ;;  %v903_v21 = vmul.f32 %v900_v10, %v1992_v47 }
 0x41d   : > { %v905_v16 = vpop.permute.xlu1 %904 }
 0x41e   : > { %v907_v17 = vpop.permute.xlu0 %906 }
 0x41f   : > { %v908_v18 = vsel %vm452_vm4, %v905_v16, %v907_v17  ;;  %v909_v19 = vsel %vm452_vm4, %v907_v17, %v905_v16 }
 0x420   : > { %v910_v22 = vmul.f32 %v909_v19, %v1996_v48  ;;  %v911_v23 = vmul.f32 %v908_v18, %v1999_v49 }
 0x421   : > { %v913_v27 = vpop.permute.xlu1 %912 }
 0x422   : > { %v960_v28 = vpack.c.bf16 %v910_v22, %v902_v20  ;;  %v915_v39 = vpop.permute.xlu0 %914  ;;  %v961_v29 = vpack.c.bf16 %v911_v23, %v903_v21 }
 0x423   : > { %v916_v30 = vsel %vm474_vm5, %v913_v27, %v915_v39  ;;  %v917_v31 = vsel %vm474_vm5, %v915_v39, %v913_v27 }
 0x424   : > { %988 = vmatprep.subr.bf16.mxu0 %v961_v29  ;;  %1047 = vmatprep.subr.bf16.mxu1 %v961_v29  ;;  %v918_v36 = vmul.f32 %v917_v31, %v2021_v2  ;;  %v919_v37 = vmul.f32 %v916_v30, %v2024_v3  ;;  %v1036_v29 = vld [vmem:[#allocation2 + $0x14] sm:$0xf]  ;;  %v971_v30 = vld [vmem:[#allocation2 + $0x10] sm:$0xf] }
 0x425   : > { %1048 = vmatpush1.bf16.msra.mxu1 %v960_v28  ;;  %v921_v32 = vpop.permute.xlu1 %920  ;;  %989 = vmatpush1.bf16.msra.mxu0 %v960_v28 }
 0x426   : > { %v923_v33 = vpop.permute.xlu0 %922 }
 0x427   : > { %v924_v34 = vsel %vm496_vm6, %v921_v32, %v923_v33  ;;  %v925_v35 = vsel %vm496_vm6, %v923_v33, %v921_v32 }
 0x428   : > { %v926_v43 = vmul.f32 %v925_v35, %v2028_v7  ;;  %v927_v44 = vmul.f32 %v924_v34, %v2031_v8 }
 0x429   : > { %v929_v45 = vpop.permute.xlu1 %928 }
 0x42a   : > { %v962_v50 = vpack.c.bf16 %v926_v43, %v918_v36  ;;  %v931_v51 = vpop.permute.xlu0 %930  ;;  %v963_v5 = vpack.c.bf16 %v927_v44, %v919_v37 }
 0x42b   : > { %v932_v6 = vsel %vm359_vm1, %v929_v45, %v931_v51  ;;  %v933_v52 = vsel %vm359_vm1, %v931_v51, %v929_v45 }
 0x42c   : > { %v934_v53 = vmul.f32 %v932_v6, %v1899_v11  ;;  %v935_v54 = vmul.f32 %v933_v52, %v1902_v12  ;;  %990 = vmatprep.subr.bf16.mxu0 %v963_v5  ;;  %1049 = vmatprep.subr.bf16.mxu1 %v963_v5  ;;  %v571_v52 = vld [vmem:[%s2504_s3] sm:$0xff] }
 0x42d   : > { %1050 = vmatpush1.bf16.msra.mxu1 %v962_v50  ;;  %v937_v55 = vpop.permute.xlu1 %936  ;;  %991 = vmatpush1.bf16.msra.mxu0 %v962_v50 }
 0x42e   : > { %v964_v56 = vpack.c.bf16 %v934_v53, %v2187_v0  ;;  %v939_v57 = vpop.permute.xlu0 %938  ;;  %v965_v58 = vpack.c.bf16 %v935_v54, %v2190_v1  ;;  %v1490_v54 = vld [vmem:[%s2504_s3 + $0x10] sm:$0xff] }
 0x42f   : > { %v940_v59 = vsel %vm526_vm7, %v937_v55, %v939_v57  ;;  %v941_v60 = vsel %vm526_vm7, %v939_v57, %v937_v55  ;;  %v1496_v57 = vld [vmem:[%s2504_s3 + $0x20] sm:$0xff] }
 0x430   : > { %992 = vmatprep.subr.bf16.mxu0 %v965_v58  ;;  %1051 = vmatprep.subr.bf16.mxu1 %v965_v58  ;;  %v942_v38 = vmul.f32 %v940_v59, %v2058_v41  ;;  %v943_v9 = vmul.f32 %v941_v60, %v2061_v42  ;;  %v1502_v59 = vld [vmem:[%s2504_s3 + $0x30] sm:$0xff] }
 0x431   : > { %1052 = vmatpush1.bf16.msra.mxu1 %v964_v56  ;;  %v945_v61 = vpop.permute.xlu1 %944  ;;  %993 = vmatpush1.bf16.msra.mxu0 %v964_v56 }
 0x432   : > { %v947_v62 = vpop.permute.xlu0 %946 }
 0x433   : > { %v948_v63 = vsel %vm383_vm0, %v945_v61, %v947_v62  ;;  %v949_v26 = vsel %vm383_vm0, %v947_v62, %v945_v61 }
 0x434   : > { %v950_v10 = vmul.f32 %v948_v63, %v1908_v14  ;;  %v951_v13 = vmul.f32 %v949_v26, %v1911_v15  ;;  %v1240_v63 = vld [vmem:[%s2507_s6] sm:$0xff] }
 0x435   : > { %v953_v16 = vpop.permute.xlu1 %952 }
 0x436   : > { %v966_v17 = vpack.c.bf16 %v950_v10, %v942_v38  ;;  %v955_v18 = vpop.permute.xlu0 %954  ;;  %v967_v19 = vpack.c.bf16 %v951_v13, %v943_v9 }
 0x437   : > { %v956_v20 = vsel %vm407_vm2, %v953_v16, %v955_v18  ;;  %v957_v21 = vsel %vm407_vm2, %v955_v18, %v953_v16 }
 0x438   : > { %v958_v22 = vmul.f32 %v956_v20, %v1925_v24  ;;  %v959_v23 = vmul.f32 %v957_v21, %v1928_v25  ;;  %994 = vmatprep.subr.bf16.mxu0 %v967_v19  ;;  %1053 = vmatprep.subr.bf16.mxu1 %v967_v19 }
 0x439   : > { %995 = vmatpush1.bf16.msra.mxu0 %v966_v17  ;;  %1054 = vmatpush1.bf16.msra.mxu1 %v966_v17 }
 0x43a   : > { %v968_v27 = vpack.c.bf16 %v958_v22, %v958_v22  ;;  %v969_v28 = vpack.c.bf16 %v959_v23, %v959_v23 }
 0x43c   : > { %1497 = vmatprep.subr.msk.bf16.mxu0 %vm581_vm8, %v969_v28  ;;  %1500 = vmatprep.subr.msk.bf16.mxu1 %vm581_vm8, %v969_v28  ;;  %v983_v39 = vsel %vm581_vm8, %v968_v27, 0 }
 0x43d   : > { %997 = vmatpush1.bf16.msra.mxu0 %v983_v39  ;;  %1056 = vmatpush1.bf16.msra.mxu1 %v983_v39 }
 0x440   : > { %1501 = vmatmul.mubr.msk.bf16.vlgmr.msra.gmra.mrb[8].mxu1 %vm577_vm9, %v1036_v29  ;;  %1498 = vmatmul.mubr.msk.bf16.vlgmr.msra.gmra.mrb[8].mxu0 %vm577_vm9, %v971_v30 }
 0x441   : > { %1220 = vmatprep.mubr.bf16.mxu0 %v1738_v40  ;;  %1282 = vmatprep.mubr.bf16.mxu1 %v1738_v40  ;;  %v2318_v40 = vpop.f32.mrb[0].mxu0 }
 0x446   : > { %v1042_v31 = vpop.permute.xlu1 %1041 }
 0x513   : > { %v1081_v32 = vpop.f32.mrb[8].mxu1 }
 0x514   : > { %v1082_v33 = vadd.f32 %v1081_v32, %v1042_v31  ;;  %v1083_v34 = vpop.f32.mrb[9].mxu1 }
 0x515   : > { %v1084_v35 = vadd.f32 %v1083_v34, %v1042_v31  ;;  %v1085_v36 = vpop.f32.mrb[10].mxu1 }
 0x516   : > { %v1088_v37 = vadd.f32 %v1082_v33, %v2187_v0  ;;  %v1086_v43 = vpop.f32.mrb[11].mxu1  ;;  %v2320_v0 = vpop.f32.mrb[1].mxu0 }
 0x517   : > { %v1089_v44 = vadd.f32 %v1084_v35, %v2190_v1  ;;  %v626_v1 = vpop.f32.mrb[2].mxu0 }
 0x518   : > { %vm1090_vm14 = vcmp.ge.f32.partialorder %v1088_v37, 0.0  ;;  %v1092_v45 = vmul.f32 0.05, %v1088_v37  ;;  %v627_v6 = vpop.f32.mrb[3].mxu0 }
 0x519   : > { %vm1091_vm15 = vcmp.ge.f32.partialorder %v1089_v44, 0.0  ;;  %v1093_v50 = vmul.f32 0.05, %v1089_v44  ;;  %v2329_v53 = vpop.f32.mrb[4].mxu0 }
 0x51a   : > { %v2286_v51 = vsel %vm1090_vm14, %v1088_v37, %v1092_v45  ;;  %v2334_v55 = vpop.f32.mrb[5].mxu0 }
 0x51b   : > { %v2288_v5 = vsel %vm1091_vm15, %v1089_v44, %v1093_v50  ;;  %1096 = vrot.lane.b32.xlu0 %v2286_v51, %s1733_s21  ;;  %v826_v56 = vpop.f32.mrb[6].mxu0 }
 0x51c   : > { %1098 = vrot.lane.b32.xlu1 %v2288_v5, %s1733_s21  ;;  %v827_v58 = vpop.f32.mrb[7].mxu0  ;;  %s2515_s21 = sshll.u32 %s1807_s30, 8 }
 0x51d   : > { %v2342_v60 = vpop.f32.mrb[8].mxu0 }
 0x51e   : > { %v2344_v61 = vpop.f32.mrb[9].mxu0 }
 0x51f   : > { %1104 = vrot.lane.b32.xlu0 %v2286_v51, %s1734_s22  ;;  %v1026_v62 = vpop.f32.mrb[10].mxu0 }
 0x520   : > { %1106 = vrot.lane.b32.xlu1 %v2288_v5, %s1734_s22  ;;  %v1027_v26 = vpop.f32.mrb[11].mxu0 }
 0x523   : > { %1112 = vrot.lane.b32.xlu0 %v2286_v51, %s1735_s23 }
 0x524   : > { %1114 = vrot.lane.b32.xlu1 %v2288_v5, %s1735_s23 }
 0x527   : > { %1120 = vrot.lane.b32.xlu0 %v2286_v51, %s1736_s19 }
 0x528   : > { %1122 = vrot.lane.b32.xlu1 %v2288_v5, %s1736_s19 }
 0x52b   : > { %1128 = vrot.lane.b32.xlu0 %v2286_v51, %s1731_s18 }
 0x52c   : > { %1130 = vrot.lane.b32.xlu1 %v2288_v5, %s1731_s18  ;;  %s1474_s18 = sshll.u32 %s2412_s17, 4 }
 0x52d   : > { %s339_s22 = scalar_lea.vmem [#allocation6], %s1474_s18 }
 0x52f   : > { %1136 = vrot.lane.b32.xlu0 %v2286_v51, %s2523_s1 }
 0x530   : > { %1138 = vrot.lane.b32.xlu1 %v2288_v5, %s2523_s1 }
 0x533   : > { %1144 = vrot.lane.b32.xlu0 %v2286_v51, %s1730_s16 }
 0x534   : > { %1146 = vrot.lane.b32.xlu1 %v2288_v5, %s1730_s16  ;;  %s1353_s16 = sshll.u32 %s339_s22, 4  ;;  %s2425_s16 = int_to_ptr.vmem [resolvable:$true] %s1353_s16 }
 0x535   : > { %s1627_s1 = scalar_lea.vmem %s2425_s16, 256  ;;  %p1634_p2 = scmp.lt.s32.totalorder %s2425_s16, %s1632_s11 }
 0x536   : > { %p1628_p6 = scmp.ne.s32.totalorder %s2425_s16, %s1627_s1  ;;  %p1635_p3 = scmp.lt.s32.totalorder %s1633_s12, %s1627_s1 }
 0x537   : > { %1152 = vrot.lane.b32.xlu0 %v2286_v51, %s1732_s25 }
 0x538   : > { %1154 = vrot.lane.b32.xlu1 %v2288_v5, %s1732_s25  ;;  %s2423_s25 = scalar_lea.hbm %s2509_s8, %s2515_s21  ;;  %p1629_p10 = pnand %p1628_p6, %p2524_p9 }
 0x539   : > { %p1636_p4 = por %p1635_p3, %p1634_p2 }
 0x53a   : > { %p1630_p12 = pneg %p1629_p10 }
 0x53b   : > { %574 = vperm.xlu0 %1583, %v571_v52  }
 0x53c   : > { %776 = vperm.xlu1 %1584, %v1490_v54   ;;  %p1637_p7 = pnand %p1636_p4, %p1630_p12 }
 0x53f   : > { %976 = vperm.xlu0 %1583, %v1496_v57  }
 0x540   : > { %1176 = vperm.xlu1 %1584, %v1502_v59  }
 0x543   : > { %1243 = vperm.xlu0 %1583, %v1240_v63  }
 0x58d   : > { %v1097_v38 = vpop.permute.xlu0 %1096 }
 0x58e   : > { %v1099_v9 = vpop.permute.xlu1 %1098 }
 0x58f   : > { %v1100_v10 = vsel %vm431_vm3, %v1097_v38, %v1099_v9  ;;  %v1101_v13 = vsel %vm431_vm3, %v1099_v9, %v1097_v38 }
 0x590   : > { %v1102_v20 = vmul.f32 %v1101_v13, %v1989_v46  ;;  %v1103_v21 = vmul.f32 %v1100_v10, %v1992_v47 }
 0x591   : > { %v1105_v16 = vpop.permute.xlu0 %1104 }
 0x592   : > { %v1107_v17 = vpop.permute.xlu1 %1106 }
 0x593   : > { %v1108_v18 = vsel %vm452_vm4, %v1105_v16, %v1107_v17  ;;  %v1109_v19 = vsel %vm452_vm4, %v1107_v17, %v1105_v16  ;;  %v1171_v16 = vld [vmem:[#allocation2 + $0x18] sm:$0xf] }
 0x594   : > { %v1110_v22 = vmul.f32 %v1109_v19, %v1996_v48  ;;  %v1111_v23 = vmul.f32 %v1108_v18, %v1999_v49 }
 0x595   : > { %v1113_v27 = vpop.permute.xlu0 %1112 }
 0x596   : > { %v1160_v28 = vpack.c.bf16 %v1110_v22, %v1102_v20  ;;  %v1115_v39 = vpop.permute.xlu1 %1114  ;;  %v1161_v29 = vpack.c.bf16 %v1111_v23, %v1103_v21 }
 0x597   : > { %v1116_v30 = vsel %vm474_vm5, %v1113_v27, %v1115_v39  ;;  %v1117_v31 = vsel %vm474_vm5, %v1115_v39, %v1113_v27 }
 0x598   : > { %1188 = vmatprep.subr.bf16.mxu0 %v1161_v29  ;;  %v1118_v49 = vmul.f32 %v1117_v31, %v2021_v2  ;;  %v1119_v33 = vmul.f32 %v1116_v30, %v2024_v3 }
 0x599   : > { %v1121_v32 = vpop.permute.xlu0 %1120  ;;  %1189 = vmatpush1.bf16.msra.mxu0 %v1160_v28 }
 0x59a   : > { %v1123_v46 = vpop.permute.xlu1 %1122 }
 0x59b   : > { %v1124_v47 = vsel %vm496_vm6, %v1121_v32, %v1123_v46  ;;  %v1125_v48 = vsel %vm496_vm6, %v1123_v46, %v1121_v32 }
 0x59c   : > { %v1126_v34 = vmul.f32 %v1125_v48, %v2028_v7  ;;  %v1127_v35 = vmul.f32 %v1124_v47, %v2031_v8 }
 0x59d   : > { %v1129_v36 = vpop.permute.xlu0 %1128 }
 0x59e   : > { %v1162_v37 = vpack.c.bf16 %v1126_v34, %v1118_v49  ;;  %v1131_v43 = vpop.permute.xlu1 %1130  ;;  %v1163_v44 = vpack.c.bf16 %v1127_v35, %v1119_v33 }
 0x59f   : > { %v1132_v45 = vsel %vm359_vm1, %v1129_v36, %v1131_v43  ;;  %v1133_v50 = vsel %vm359_vm1, %v1131_v43, %v1129_v36 }
 0x5a0   : > { %v1134_v1 = vmul.f32 %v1132_v45, %v1899_v11  ;;  %v1135_v2 = vmul.f32 %v1133_v50, %v1902_v12  ;;  %1190 = vmatprep.subr.bf16.mxu0 %v1163_v44 }
 0x5a1   : > { %v1137_v3 = vpop.permute.xlu0 %1136  ;;  %1191 = vmatpush1.bf16.msra.mxu0 %v1162_v37 }
 0x5a2   : > { %v1164_v7 = vpack.c.bf16 %v1134_v1, %v2286_v51  ;;  %v1139_v8 = vpop.permute.xlu1 %1138  ;;  %v1165_v6 = vpack.c.bf16 %v1135_v2, %v2288_v5  ;;  %v1239_v1 = vld [vmem:[%s2506_s5] sm:$0xf] }
 0x5a3   : > { %v1140_v52 = vsel %vm526_vm7, %v1137_v3, %v1139_v8  ;;  %v1141_v54 = vsel %vm526_vm7, %v1139_v8, %v1137_v3 }
 0x5a4   : > { %1192 = vmatprep.subr.bf16.mxu0 %v1165_v6  ;;  %v1142_v51 = vmul.f32 %v1140_v52, %v2058_v41  ;;  %v1143_v5 = vmul.f32 %v1141_v54, %v2061_v42 }
 0x5a5   : > { %v1145_v56 = vpop.permute.xlu0 %1144  ;;  %1193 = vmatpush1.bf16.msra.mxu0 %v1164_v7 }
 0x5a6   : > { %v1147_v11 = vpop.permute.xlu1 %1146 }
 0x5a7   : > { %v1148_v12 = vsel %vm383_vm0, %v1145_v56, %v1147_v11  ;;  %v1149_v57 = vsel %vm383_vm0, %v1147_v11, %v1145_v56 }
 0x5a8   : > { %v1150_v58 = vmul.f32 %v1148_v12, %v1908_v14  ;;  %v1151_v59 = vmul.f32 %v1149_v57, %v1911_v15 }
 0x5a9   : > { %v1153_v62 = vpop.permute.xlu0 %1152 }
 0x5aa   : > { %v1166_v63 = vpack.c.bf16 %v1150_v58, %v1142_v51  ;;  %v1155_v26 = vpop.permute.xlu1 %1154  ;;  %v1167_v38 = vpack.c.bf16 %v1151_v59, %v1143_v5 }
 0x5ab   : > { %v1156_v9 = vsel %vm407_vm2, %v1153_v62, %v1155_v26  ;;  %v1157_v10 = vsel %vm407_vm2, %v1155_v26, %v1153_v62 }
 0x5ac   : > { %v1158_v13 = vmul.f32 %v1156_v9, %v1925_v24  ;;  %v1159_v41 = vmul.f32 %v1157_v10, %v1928_v25  ;;  %1194 = vmatprep.subr.bf16.mxu0 %v1167_v38 }
 0x5ad   : > { %1195 = vmatpush1.bf16.msra.mxu0 %v1166_v63 }
 0x5ae   : > { %v1168_v42 = vpack.c.bf16 %v1158_v13, %v1158_v13  ;;  %v1169_v14 = vpack.c.bf16 %v1159_v41, %v1159_v41 }
 0x5b0   : > { %1503 = vmatprep.subr.msk.bf16.mxu0 %vm581_vm8, %v1169_v14  ;;  %v1183_v15 = vsel %vm581_vm8, %v1168_v42, 0  ;;  %vm1246_vm8 = vcmask 261120  }
 0x5b1   : > { %1197 = vmatpush1.bf16.msra.mxu0 %v1183_v15 }
 0x5b4   : > { %1504 = vmatmul.mubr.msk.bf16.vlgmr.msra.gmra.mrb[12].mxu0 %vm577_vm9, %v1171_v16 }
 0x5ba   : > { %v575_v17 = vpop.permute.xlu0 %574 }
 0x5bb   : > { %v623_v4 = vadd.f32 %v2318_v40, %v575_v17  ;;  %v625_v18 = vadd.f32 %v2320_v0, %v575_v17  ;;  %v777_v24 = vpop.permute.xlu1 %776 }
 0x5bc   : > { %v823_v25 = vadd.f32 %v2329_v53, %v777_v24  ;;  %v825_v19 = vadd.f32 %v2334_v55, %v777_v24 }
 0x5bd   : > { %vm629_vm0 = vcmp.ge.f32.partialorder %v623_v4, 0.0  ;;  %vm630_vm1 = vcmp.ge.f32.partialorder %v625_v18, 0.0  ;;  %v631_v20 = vmul.f32 0.05, %v623_v4  ;;  %v632_v21 = vmul.f32 0.05, %v625_v18 }
 0x5be   : > { %vm829_vm2 = vcmp.ge.f32.partialorder %v823_v25, 0.0  ;;  %vm830_vm3 = vcmp.ge.f32.partialorder %v825_v19, 0.0  ;;  %v831_v22 = vmul.f32 0.05, %v823_v25  ;;  %v832_v23 = vmul.f32 0.05, %v825_v19  ;;  %v977_v0 = vpop.permute.xlu0 %976 }
 0x5bf   : > { %v633_v27 = vsel %vm629_vm0, %v623_v4, %v631_v20  ;;  %v634_v28 = vsel %vm630_vm1, %v625_v18, %v632_v21  ;;  %v1023_v53 = vadd.f32 %v2342_v60, %v977_v0  ;;  %v1025_v55 = vadd.f32 %v2344_v61, %v977_v0  ;;  %v1177_v31 = vpop.permute.xlu1 %1176 }
 0x5c0   : > { %v833_v39 = vsel %vm829_vm2, %v823_v25, %v831_v22  ;;  %v834_v29 = vsel %vm830_vm3, %v825_v19, %v832_v23 }
 0x5c1   : > { %v1235_v40 = vpack.c.bf16 %v833_v39, %v633_v27  ;;  %v1236_v30 = vpack.c.bf16 %v834_v29, %v634_v28  ;;  %v1031_v46 = vmul.f32 0.05, %v1023_v53  ;;  %vm1029_vm4 = vcmp.ge.f32.partialorder %v1023_v53, 0.0 }
 0x5c2   : > { %v1032_v49 = vmul.f32 0.05, %v1025_v55  ;;  %vm1030_vm5 = vcmp.ge.f32.partialorder %v1025_v55, 0.0  ;;  %v1244_v2 = vpop.permute.xlu0 %1243 }
 0x5c3   : > { %1250 = vmatprep.subr.bf16.mxu1 %v1236_v30  ;;  %v1033_v43 = vsel %vm1029_vm4, %v1023_v53, %v1031_v46 }
 0x5c4   : > { %1251 = vmatpush1.bf16.msra.mxu1 %v1235_v40  ;;  %v1034_v45 = vsel %vm1030_vm5, %v1025_v55, %v1032_v49 }
 0x687   : > { %v1222_v32 = vpop.f32.mrb[12].mxu0 }
 0x688   : > { %v1223_v47 = vadd.f32 %v1222_v32, %v1177_v31  ;;  %v1224_v48 = vpop.f32.mrb[13].mxu0 }
 0x689   : > { %v1225_v33 = vadd.f32 %v1224_v48, %v1177_v31  ;;  %v1226_v34 = vpop.f32.mrb[14].mxu0 }
 0x68a   : > { %vm1229_vm6 = vcmp.ge.f32.partialorder %v1223_v47, 0.0  ;;  %v1231_v35 = vmul.f32 0.05, %v1223_v47  ;;  %v1227_v36 = vpop.f32.mrb[15].mxu0 }
 0x68b   : > { %vm1230_vm7 = vcmp.ge.f32.partialorder %v1225_v33, 0.0  ;;  %v1232_v37 = vmul.f32 0.05, %v1225_v33 }
 0x68c   : > { %v1233_v44 = vsel %vm1229_vm6, %v1223_v47, %v1231_v35 }
 0x68d   : > { %v1237_v60 = vpack.c.bf16 %v1233_v44, %v1033_v43  ;;  %v1234_v61 = vsel %vm1230_vm7, %v1225_v33, %v1232_v37 }
 0x68e   : > { %v1238_v50 = vpack.c.bf16 %v1234_v61, %v1034_v45 }
 0x690   : > { %1252 = vmatprep.subr.bf16.mxu1 %v1238_v50 }
 0x691   : > { %1253 = vmatpush1.bf16.msra.mxu1 %v1237_v60 }
 0x694   : > { %1505 = vmatmul.mubr.msk.bf16.vlgmr.msra.gmra.mrb[12].mxu1 %vm1246_vm8, %v1239_v1 }
 0x767   : > { %v1284_v3 = vpop.f32.mrb[12].mxu1 }
 0x768   : > { %v1285_v7 = vadd.f32 %v1284_v3, %v1244_v2  ;;  %v1286_v8 = vpop.f32.mrb[13].mxu1 }
 0x769   : > { %v1287_v6 = vadd.f32 %v1286_v8, %v1244_v2  ;;  %v1288_v52 = vpop.f32.mrb[14].mxu1 }
 0x76a   : > { %v1291_v54 = vsub.f32 0.0, %v1285_v7  ;;  %v1289_v56 = vpop.f32.mrb[15].mxu1 }
 0x76b   : > { %v1292_v11 = vsub.f32 0.0, %v1287_v6 }
 0x76c   : > { %v1293_v12 = vmul.f32 1.442695, %v1291_v54 }
 0x76d   : > { %v1295_v57 = vmul.f32 1.442695, %v1292_v11 }
 0x76e   : > { %1585 = vpow2.f32 %v1293_v12 }
 0x76f   : > { %1587 = vpow2.f32 %v1295_v57 }
 0x778   : > { %v1586_v51 = vpop.eup %1585 }
 0x779   : > { %v1588_v5 = vpop.eup %1587  ;;  %v1297_v58 = vadd.f32 1.0, %v1586_v51 }
 0x77a   : > { %v1298_v59 = vadd.f32 1.0, %v1588_v5 }
 0x77b   : > { %1589 = vrcp.f32 %v1297_v58 }
 0x77c   : > { %1591 = vrcp.f32 %v1298_v59 }
 0x785   : > { %v1590_v62 = vpop.eup %1589 }
 0x786   : > { %v1592_v63 = vpop.eup %1591  ;;  %v1303_v26 = vmax.f32 %v1590_v62, 0.0001 }
 0x787   : > { %v1304_v38 = vmax.f32 %v1592_v63, 0.0001 }
 0x788   : > { %v1305_v9 = vmin.f32 %v1303_v26, 1.0 }
 0x789   : > { %v1306_v10 = vmin.f32 %v1304_v38, 1.0 }
 0x78a   : > { %1593 = vrcp.f32 %v1305_v9  ;;  %1317 = vst [vmem:[%s339_s22] sm:$0xff] %v1305_v9 }
 0x78b   : > { %1595 = vrcp.f32 %v1306_v10  ;;  %1318 = vst [vmem:[%s339_s22 + $0x8] sm:$0xff] %v1306_v10 }
 0x78c   : > { %1640 = shalt.err (!%p1637_p7)
}
 0x78d   : > { %s1641_s22 = scalar_lea.hbm %s2423_s25, 256  ;;  %s1645_s9 = scalar_lea.hbm %s2509_s8, 512 }
 0x78e   : > { %p1642_p8 = scmp.ne.s32.totalorder %s2423_s25, %s1641_s22  ;;  %p1646_p1 = scmp.lt.u32.totalorder %s2423_s25, %s2509_s8 }
 0x78f   : > { %p1647_p0 = scmp.lt.u32.totalorder %s1645_s9, %s1641_s22  ;;  %p1649_p6 = scmp.lt.u32.totalorder %s1641_s22, %s2423_s25 }
 0x790   : > { %p1643_p11 = pnand %p1642_p8, %p2524_p9 }
 0x791   : > { %p1648_p5 = por %p1647_p0, %p1646_p1 }
 0x792   : > { %p1644_p13 = pneg %p1643_p11 }
 0x793   : > { %p1650_p10 = por %p1649_p6, %p1648_p5 }
 0x795   : > { %p1651_p12 = pnand %p1650_p10, %p1644_p13 }
 0x797   : > { %1654 = shalt.err (!%p1651_p12)
}
 0x798   : > { %1522 = dma.vmem_to_hbm [thread:$0]  (%p2524_p9), %s2425_s16, 256, %s2423_s25, %s1325_s20   ;;  %v1594_v13 = vpop.eup %1593  ;;  %v1597_v42 = vld [vmem:[%s1874_s24] sm:$0xff]  ;;  %v1598_v15 = vld [vmem:[%s1874_s24 + $0x8] sm:$0xff] }
 0x799   : > { %v1596_v41 = vpop.eup %1595  ;;  %v1308_v14 = vmul.f32 %v1597_v42, %v1594_v13  ;;  %s332_s21 = scalar_lea.vmem [#allocation5], %s1474_s18  ;;  %s2525_s12 = sshll.u32 %s1807_s30, 8 }
 0x79a   : > { %v1310_v16 = vmul.f32 %v1598_v15, %v1596_v41  ;;  %s1339_s1 = sshll.u32 %s332_s21, 4  ;;  %s2458_s16 = scalar_lea.hbm %s2508_s7, %s2525_s12  ;;  %s2460_s1 = int_to_ptr.vmem [resolvable:$true] %s1339_s1 }
 0x79b   : > { %v1311_v17 = vmax.f32 %v1308_v14, 0.0  ;;  %s1320_s24 = scalar_lea.sflag [#allocation4], %s2412_s17  ;;  %s1655_s25 = scalar_lea.vmem %s2460_s1, 256 }
 0x79c   : > { %v1312_v4 = vmax.f32 %v1310_v16, 0.0  ;;  %p1656_p2 = scmp.ne.s32.totalorder %s2460_s1, %s1655_s25  ;;  %s1740_s18 = smov [#allocation5]  }
 0x79d   : > { %v1313_v18 = vmin.f32 %v1311_v17, 1.0  ;;  %s1659_s30 = sshll.u32 %s1740_s18, 4  ;;  %s1660_s30 = int_to_ptr.vmem [resolvable:$false] %s1659_s30 }
 0x79e   : > { %v1314_v24 = vmin.f32 %v1312_v4, 1.0  ;;  %p1657_p3 = pnand %p1656_p2, %p2524_p9  ;;  %s1661_s20 = scalar_lea.vmem %s1660_s30, 512 }
 0x79f   : > { %1315 = vst [vmem:[%s332_s21] sm:$0xff] %v1313_v18  ;;  %p1662_p7 = scmp.lt.s32.totalorder %s2460_s1, %s1660_s30  ;;  %p1663_p8 = scmp.lt.s32.totalorder %s1661_s20, %s1655_s25 }
 0x7a0   : > { %1316 = vst [vmem:[%s332_s21 + $0x8] sm:$0xff] %v1314_v24  ;;  %p1658_p4 = pneg %p1657_p3 }
 0x7a1   : > { %p1664_p11 = por %p1663_p8, %p1662_p7 }
 0x7a3   : > { %p1665_p13 = pnand %p1664_p11, %p1658_p4 }
 0x7a5   : > { %1668 = shalt.err (!%p1665_p13)
}
 0x7a6   : > { %s1669_s17 = scalar_lea.hbm %s2458_s16, 256  ;;  %s1673_s11 = scalar_lea.hbm %s2508_s7, 512 }
 0x7a7   : > { %p1670_p1 = scmp.ne.s32.totalorder %s2458_s16, %s1669_s17  ;;  %p1674_p6 = scmp.lt.u32.totalorder %s2458_s16, %s2508_s7 }
 0x7a8   : > { %p1675_p10 = scmp.lt.u32.totalorder %s1673_s11, %s1669_s17  ;;  %p1677_p2 = scmp.lt.u32.totalorder %s1669_s17, %s2458_s16 }
 0x7a9   : > { %p1671_p0 = pnand %p1670_p1, %p2524_p9 }
 0x7aa   : > { %p1676_p12 = por %p1675_p10, %p1674_p6 }
 0x7ab   : > { %p1672_p5 = pneg %p1671_p0 }
 0x7ac   : > { %p1678_p3 = por %p1677_p2, %p1676_p12 }
 0x7ae   : > { %p1679_p4 = pnand %p1678_p3, %p1672_p5 }
 0x7b0   : > { %1682 = shalt.err (!%p1679_p4)
}
 0x7b1   : > { %1521 = dma.vmem_to_hbm [thread:$0]  (%p2524_p9), %s2460_s1, 256, %s2458_s16, %s1320_s24  }
 0x7b2 PF: > { %p1538_p7 = scmp.ge.s32.totalorder %s1725_s29, 2  ;;  %s1365_s22 = sand.u32 1, %s1713_s26  }
 0x7b3   : > { %p2526_p8 = scmp.ne.s32.totalorder %s2517_s15, 0  ;;  %s1366_s23 = scalar_lea.sflag [#allocation4], %s1365_s22 }
 0x7b5   : > { %p1530_p11 = pnand %p1538_p7, %p2526_p8 }
 0x7b7   : > { %1704 = dma.done.wait (!%p1530_p11), %s1366_s23, 256  }
 0x7b8   : > { %1706 = vsyncadd (!%p1530_p11), %s1366_s23, 4294967040  ;;  %s1375_s25 = scalar_lea.sflag [#allocation7], %s1365_s22 }
 0x7b9   : > { %1708 = dma.done.wait (!%p1530_p11), %s1375_s25, 256  }
 0x7ba   : > { %1710 = vsyncadd (!%p1530_p11), %s1375_s25, 4294967040  ;;  %p23_p9 = scmp.ge.s32.totalorder %s1811_s10, 4   ;;  %s2527_s26 = smov %s1717_s27 }
 0x7bb   : > { %s2528_s27 = smov %s1721_s28  ;;  %s2529_s28 = smov %s1822_s13 }
 0x7bc   : > { %s2530_s29 = smov %s1811_s10  ;;  %25 = sbr.rel (!%p23_p9) target bundleno = 6 (0x6), region = 127 }
 0x7c3   :  { %1380 = vsyncpa [#allocation3], 1 }
 0x7c4   :  { %1382 = vsyncpa [#allocation3 + $0x1], 1 }
 0x7c5   :  { %1383 = vsyncpa [#allocation4], 1 }
 0x7c6   :  { %1385 = vsyncpa [#allocation4 + $0x1], 1 }
 0x7c7   :  { %1386 = vsyncpa [#allocation7], 1 }
 0x7c8   :  { %1388 = vsyncpa [#allocation7 + $0x1], 1 }

</bundles_post_ra>
